<compile_context>
chip_gen: v7x
topology: tpu7x:2x2x1
jax: 0.10.0
libtpu: 0.0.40
codegen_flags: <defaults>
</compile_context>

<pallas_src>
import functools

import numpy as np
import jax
import jax.numpy as jnp
from jax.experimental import pallas as pl
from jax.experimental.pallas import tpu as pltpu

_LANE = 128
_SUBLANE = 8


def _round_up(x, m):
    return ((x + m - 1) // m) * m


def _tril_flat_index(i, j):
    # torch.tril_indices(ny, ny) is row-major: element (i, j), j <= i, sits at
    # flat position i*(i+1)//2 + j inside y[:, ny:].
    return i * (i + 1) // 2 + j


def _build_gather_mats(ny, head_pad, out_pad):
    """Constant 0/1 matrices GA, GB of shape (head_pad, ny*out_pad) such that,
    for the lane-padded last-layer activation l (softplus already applied on
    the diagonal tril lanes):
        prod = (l @ GA) * (l @ GB)                       # (tb, ny*out_pad)
        cov  = sum_k prod[:, k*out_pad:(k+1)*out_pad]    # (tb, out_pad)
    places cov[i, j] = sum_k L[i, k] * L[j, k] in output lane ny + i*ny + j and
    zeros everywhere else (so mu can simply be added in lanes [0, ny))."""
    gA = np.zeros((ny, head_pad, out_pad), np.float32)
    gB = np.zeros((ny, head_pad, out_pad), np.float32)
    for k in range(ny):
        for i in range(ny):
            for j in range(ny):
                c = ny + i * ny + j
                if k <= i:
                    gA[k, ny + _tril_flat_index(i, k), c] = 1.0
                if k <= j:
                    gB[k, ny + _tril_flat_index(j, k), c] = 1.0
    GA = np.concatenate(list(gA), axis=1)   # (head_pad, ny*out_pad)
    GB = np.concatenate(list(gB), axis=1)
    return GA, GB


def _make_net_pu_kernel(num_linear, ny, out_pad, compute_dtype):
    """Kernel refs: (x, W0, b0, ..., W_{L-1}, b_{L-1}, GA, GB, out)."""

    def kernel(*refs):
        x_ref = refs[0]
        param_refs = refs[1:1 + 2 * num_linear]
        gA_ref = refs[1 + 2 * num_linear]
        gB_ref = refs[2 + 2 * num_linear]
        o_ref = refs[-1]

        h = x_ref[...]                                  # (tb, p0) compute_dtype
        for i in range(num_linear):
            w = param_refs[2 * i][...]
            b = param_refs[2 * i + 1][...]
            h = jnp.dot(h, w, preferred_element_type=jnp.float32) + b
            if i < num_linear - 1:
                # nonlinearity (ReLU); F.dropout is identity in eval mode.
                # TODO(synk): MC-dropout (drop_bool=True) sampling not implemented.
                h = jnp.maximum(h, 0.0).astype(compute_dtype)

        # ---------------- Net_PU head (n_output > 1 branch) ----------------
        # h is (tb, head_pad) f32; head_pad is tied to n_output only, so all the
        # elementwise head work below is fixed-cost regardless of layer_width.
        head_pad = h.shape[-1]
        col = jax.lax.broadcasted_iota(jnp.int32, h.shape, 1)
        diag_lanes = [ny + i * (i + 3) // 2 for i in range(ny)]
        diag_mask = functools.reduce(jnp.logical_or,
                                     [col == d for d in diag_lanes])
        # softplus only on the diagonal entries of the tril parameterisation.
        l = jnp.where(diag_mask, jax.nn.softplus(h), h).astype(compute_dtype)

        # cov = L @ L^T via two wide gather matmuls + ny-1 lane-aligned adds.
        left = jnp.dot(l, gA_ref[...], preferred_element_type=jnp.float32)
        right = jnp.dot(l, gB_ref[...], preferred_element_type=jnp.float32)
        prod = left * right                             # (tb, ny*out_pad)
        cov = prod[:, 0:out_pad]
        for k in range(1, ny):
            cov = cov + prod[:, k * out_pad:(k + 1) * out_pad]

        # mu passes through untouched into output lanes [0, ny).
        mu_head = jnp.where(col < ny, h, 0.0)           # (tb, head_pad) f32
        if head_pad < out_pad:
            mu_slab = jnp.concatenate(
                [mu_head,
                 jnp.zeros((mu_head.shape[0], out_pad - head_pad), jnp.float32)],
                axis=1)
        else:
            mu_slab = mu_head[:, :out_pad]

        o_ref[...] = (cov + mu_slab).astype(o_ref.dtype)

    return kernel


def net_pu_forward(x, params, n_output_y, *, block_batch=512, use_bf16=True):
    """Net_PU.forward (eval mode) as one Pallas TPU kernel.

    params: list of (W, b) with W of shape (in_features, out_features) -- i.e.
    the PyTorch Linear weight already transposed -- and b of shape (out_features,).
    """
    num_linear = len(params)
    ny = int(n_output_y)
    n_output = params[-1][0].shape[1]
    # TODO(synk): n_output == 1 branch of Net_PU (stack of [x[:,0], softplus(x[:,1])])
    # is not implemented; only the n_output > 1 covariance head is translated.
    assert n_output == ny + ny * (ny + 1) // 2, "n_output inconsistent with n_output_y"
    out_cols = ny + ny * ny

    compute_dtype = jnp.bfloat16 if use_bf16 else jnp.float32
    wsize = jnp.dtype(compute_dtype).itemsize

    batch, n_in = x.shape
    # Decoupled padding: pad each feature dim independently to 128 lanes.
    p_feats = [_round_up(max(n_in, 1), _LANE)] + \
              [_round_up(w.shape[1], _LANE) for w, _ in params]
    head_pad = p_feats[-1]
    out_pad = _round_up(out_cols, _LANE)

    # Batch tile: as large as block_batch allows, but keep >= 2 grid steps when
    # the batch permits so the "parallel" axis can shard across v7x's 2 TCs.
    tb = _round_up(min(block_batch, max(batch, _SUBLANE)), _SUBLANE)
    if batch > _SUBLANE:
        while _round_up(batch, tb) // tb < 2 and tb > _SUBLANE:
            tb = max(_SUBLANE, _round_up(tb // 2, _SUBLANE))
    b_pad = _round_up(batch, tb)

    x_p = jnp.zeros((b_pad, p_feats[0]), compute_dtype).at[:batch, :n_in].set(
        x.astype(compute_dtype))

    flat, flat_specs = [], []
    for li, (w, b) in enumerate(params):
        fi, fo = w.shape
        pi, po = p_feats[li], p_feats[li + 1]
        w_p = jnp.zeros((pi, po), compute_dtype).at[:fi, :fo].set(
            w.astype(compute_dtype))
        b_p = jnp.zeros((1, po), jnp.float32).at[0, :fo].set(
            b.astype(jnp.float32))
        flat += [w_p, b_p]
        flat_specs += [pl.BlockSpec((pi, po), lambda i: (0, 0)),
                       pl.BlockSpec((1, po), lambda i: (0, 0))]

    GA_np, GB_np = _build_gather_mats(ny, head_pad, out_pad)
    GA = jnp.asarray(GA_np, compute_dtype)   # 0/1 entries: exact in bf16
    GB = jnp.asarray(GB_np, compute_dtype)
    g_spec = pl.BlockSpec((head_pad, ny * out_pad), lambda i: (0, 0))

    kernel = _make_net_pu_kernel(num_linear, ny, out_pad, compute_dtype)
    grid = (b_pad // tb,)

    # Cost estimate (approximate but dimension-correct after padding/dtype changes).
    mlp_flops = 2 * b_pad * sum(p_feats[i] * p_feats[i + 1]
                                for i in range(num_linear))
    head_flops = 2 * 2 * b_pad * head_pad * (ny * out_pad)
    flops = mlp_flops + head_flops + 6 * b_pad * out_pad * ny
    transcendentals = 2 * b_pad * head_pad   # exp + log per softplus element
    bytes_accessed = (int(x_p.size) * wsize + b_pad * out_pad * 4
                      + sum(int(a.size) * a.dtype.itemsize for a in flat)
                      + (int(GA.size) + int(GB.size)) * wsize)

    # VMEM budget (conservative: assume everything double-buffered) + headroom.
    vmem_need = 2 * (tb * p_feats[0] * wsize + tb * out_pad * 4)
    vmem_need += 2 * sum(int(a.size) * a.dtype.itemsize for a in flat)
    vmem_need += 2 * (int(GA.size) + int(GB.size)) * wsize
    vmem_need += 4 * tb * (max(p_feats) + 3 * ny * out_pad)
    vmem_limit = int(min(max(2 * vmem_need + (4 << 20), 32 << 20), 48 << 20))

    out = pl.pallas_call(
        kernel,
        out_shape=jax.ShapeDtypeStruct((b_pad, out_pad), jnp.float32),
        grid=grid,
        in_specs=[pl.BlockSpec((tb, p_feats[0]), lambda i: (i, 0))]
                 + flat_specs + [g_spec, g_spec],
        out_specs=pl.BlockSpec((tb, out_pad), lambda i: (i, 0)),
        compiler_params=pltpu.CompilerParams(
            dimension_semantics=("parallel",),
            vmem_limit_bytes=vmem_limit),
        cost_estimate=pl.CostEstimate(flops=int(flops),
                                      transcendentals=int(transcendentals),
                                      bytes_accessed=int(bytes_accessed)),
    )(x_p, *flat, GA, GB)
    return out[:batch, :out_cols]


def _ref_forward(x, params, ny, compute_dtype=jnp.float32):
    """Pure-JAX reference of Net_PU.forward (eval mode, n_output > 1). Matmul
    inputs are rounded to `compute_dtype` (matching the kernel's MXU path),
    with f32 accumulation everywhere."""
    prec = jax.lax.Precision.HIGHEST
    h = x.astype(jnp.float32)
    n = len(params)
    for i, (w, b) in enumerate(params):
        h = jnp.dot(h.astype(compute_dtype), w.astype(compute_dtype),
                    precision=prec, preferred_element_type=jnp.float32)
        h = h + b.astype(jnp.float32)
        if i < n - 1:
            h = jnp.maximum(h, 0.0)
    mu = h[:, :ny]
    bsz = h.shape[0]
    r, c = np.tril_indices(ny)
    L = jnp.zeros((bsz, ny, ny), jnp.float32).at[:, r, c].set(h[:, ny:])
    d = np.arange(ny)
    L = L.at[:, d, d].set(jax.nn.softplus(L[:, d, d]))
    Lc = L.astype(compute_dtype).astype(jnp.float32)
    cov = jnp.einsum('bik,bjk->bij', Lc, Lc, precision=prec)
    return jnp.concatenate([mu, cov.reshape(bsz, ny * ny)], axis=1)


if __name__ == "__main__":
    # Small shapes consistent with the module:
    # net_params = {n_input: 8, layer_width: 32, num_layers: 2, n_output: 9}
    # n_output_y = int(-1.5 + sqrt(1.5**2 + 2*9)) = 3  (mu: 3, tril(3x3): 6)
    batch, n_input, layer_width, num_layers, n_output = 256, 8, 32, 2, 9
    n_output_y = int(-1.5 + np.sqrt(1.5 ** 2 + 2 * n_output))

    key = jax.random.PRNGKey(0)
    dims = [n_input] + [layer_width] * num_layers + [n_output]
    params = []
    for i in range(len(dims) - 1):
        key, kw, kb = jax.random.split(key, 3)
        fan_in, fan_out = dims[i], dims[i + 1]
        # Deterministic stand-in for corr_init_matrix: uniform in
        # (-sqrt(1/fan_in), sqrt(1/fan_in)) — same range as (2*cdf-1)*sqrt(1/in).
        w = jax.random.uniform(kw, (fan_in, fan_out), jnp.float32,
                               minval=-1.0, maxval=1.0) * np.sqrt(1.0 / fan_in)
        b = jax.random.uniform(kb, (fan_out,), jnp.float32,
                               minval=-1.0, maxval=1.0) * np.sqrt(1.0 / fan_in)
        params.append((w, b))

    key, kx = jax.random.split(key)
    x = jax.random.normal(kx, (batch, n_input), jnp.float32)

    # f32 MXU path: tight tolerance against the f32 reference.
    out_f32 = jax.block_until_ready(
        net_pu_forward(x, params, n_output_y, block_batch=512, use_bf16=False))
    ref_f32 = _ref_forward(x, params, n_output_y, jnp.float32)
    np.testing.assert_allclose(np.asarray(out_f32), np.asarray(ref_f32),
                               rtol=1e-4, atol=1e-5)

    # bf16 MXU path (the fast path on v6e/v7x): compare against a reference with
    # matching bf16-rounded matmul inputs and f32 accumulation.
    out_bf16 = jax.block_until_ready(
        net_pu_forward(x, params, n_output_y, block_batch=512, use_bf16=True))
    ref_bf16 = _ref_forward(x, params, n_output_y, jnp.bfloat16)
    np.testing.assert_allclose(np.asarray(out_bf16), np.asarray(ref_bf16),
                               rtol=2e-3, atol=2e-3)

    print("KERNEL_OK")
</pallas_src>

<mosaic_0001>
module attributes {stable_mosaic.version = 11 : i64} {
  func.func @kernel(%arg0: i32, %arg1: memref<128x128xf32, #tpu.memory_space<vmem>>, %arg2: memref<128x128xf32, #tpu.memory_space<vmem>>, %arg3: memref<1x128xf32, #tpu.memory_space<vmem>>, %arg4: memref<128x128xf32, #tpu.memory_space<vmem>>, %arg5: memref<1x128xf32, #tpu.memory_space<vmem>>, %arg6: memref<128x128xf32, #tpu.memory_space<vmem>>, %arg7: memref<1x128xf32, #tpu.memory_space<vmem>>, %arg8: memref<128x384xf32, #tpu.memory_space<vmem>>, %arg9: memref<128x384xf32, #tpu.memory_space<vmem>>, %arg10: memref<128x128xf32, #tpu.memory_space<vmem>>) attributes {dimension_semantics = [#tpu.dimension_semantics<parallel>], iteration_bounds = array<i64: 2>, scalar_prefetch = 0 : i64, scratch_operands = 0 : i64, tpu.core_type = #tpu.core_type<tc>, window_params = [{transform_indices = @transform_0, window_bounds = array<i64: 128, 128>}, {pipeline_mode = #tpu.pipeline_mode<synchronous>, transform_indices = @transform_1, window_bounds = array<i64: 128, 128>}, {pipeline_mode = #tpu.pipeline_mode<synchronous>, transform_indices = @transform_2, window_bounds = array<i64: 1, 128>}, {pipeline_mode = #tpu.pipeline_mode<synchronous>, transform_indices = @transform_3, window_bounds = array<i64: 128, 128>}, {pipeline_mode = #tpu.pipeline_mode<synchronous>, transform_indices = @transform_4, window_bounds = array<i64: 1, 128>}, {pipeline_mode = #tpu.pipeline_mode<synchronous>, transform_indices = @transform_5, window_bounds = array<i64: 128, 128>}, {pipeline_mode = #tpu.pipeline_mode<synchronous>, transform_indices = @transform_6, window_bounds = array<i64: 1, 128>}, {pipeline_mode = #tpu.pipeline_mode<synchronous>, transform_indices = @transform_7, window_bounds = array<i64: 128, 384>}, {pipeline_mode = #tpu.pipeline_mode<synchronous>, transform_indices = @transform_8, window_bounds = array<i64: 128, 384>}, {transform_indices = @transform_9, window_bounds = array<i64: 128, 128>}]} {
    %c0 = arith.constant 0 : index
    %c0_0 = arith.constant 0 : index
    %0 = vector.load %arg1[%c0, %c0_0] : memref<128x128xf32, #tpu.memory_space<vmem>>, vector<128x128xf32>
    %c0_1 = arith.constant 0 : index
    %c0_2 = arith.constant 0 : index
    %1 = vector.load %arg2[%c0_1, %c0_2] : memref<128x128xf32, #tpu.memory_space<vmem>>, vector<128x128xf32>
    %c0_3 = arith.constant 0 : index
    %c0_4 = arith.constant 0 : index
    %2 = vector.load %arg3[%c0_3, %c0_4] : memref<1x128xf32, #tpu.memory_space<vmem>>, vector<1x128xf32>
    %cst = arith.constant dense<0.000000e+00> : vector<128x128xf32>
    %3 = tpu.matmul %0, %1, %cst {dimension_numbers = #tpu.dot_dimension_numbers<[1], [0], [0], [1], [0, 0, 1, 1], [], []>} : vector<128x128xf32>, vector<128x128xf32>, vector<128x128xf32> -> vector<128x128xf32>
    %4 = vector.broadcast %2 : vector<1x128xf32> to vector<128x128xf32>
    %5 = arith.addf %3, %4 : vector<128x128xf32>
    %cst_5 = arith.constant 0.000000e+00 : f32
    %6 = vector.broadcast %cst_5 : f32 to vector<128x128xf32>
    %7 = arith.maximumf %5, %6 : vector<128x128xf32>
    %c0_6 = arith.constant 0 : index
    %c0_7 = arith.constant 0 : index
    %8 = vector.load %arg4[%c0_6, %c0_7] : memref<128x128xf32, #tpu.memory_space<vmem>>, vector<128x128xf32>
    %c0_8 = arith.constant 0 : index
    %c0_9 = arith.constant 0 : index
    %9 = vector.load %arg5[%c0_8, %c0_9] : memref<1x128xf32, #tpu.memory_space<vmem>>, vector<1x128xf32>
    %cst_10 = arith.constant dense<0.000000e+00> : vector<128x128xf32>
    %10 = tpu.matmul %7, %8, %cst_10 {dimension_numbers = #tpu.dot_dimension_numbers<[1], [0], [0], [1], [0, 0, 1, 1], [], []>} : vector<128x128xf32>, vector<128x128xf32>, vector<128x128xf32> -> vector<128x128xf32>
    %11 = vector.broadcast %9 : vector<1x128xf32> to vector<128x128xf32>
    %12 = arith.addf %10, %11 : vector<128x128xf32>
    %cst_11 = arith.constant 0.000000e+00 : f32
    %13 = vector.broadcast %cst_11 : f32 to vector<128x128xf32>
    %14 = arith.maximumf %12, %13 : vector<128x128xf32>
    %c0_12 = arith.constant 0 : index
    %c0_13 = arith.constant 0 : index
    %15 = vector.load %arg6[%c0_12, %c0_13] : memref<128x128xf32, #tpu.memory_space<vmem>>, vector<128x128xf32>
    %c0_14 = arith.constant 0 : index
    %c0_15 = arith.constant 0 : index
    %16 = vector.load %arg7[%c0_14, %c0_15] : memref<1x128xf32, #tpu.memory_space<vmem>>, vector<1x128xf32>
    %cst_16 = arith.constant dense<0.000000e+00> : vector<128x128xf32>
    %17 = tpu.matmul %14, %15, %cst_16 {dimension_numbers = #tpu.dot_dimension_numbers<[1], [0], [0], [1], [0, 0, 1, 1], [], []>} : vector<128x128xf32>, vector<128x128xf32>, vector<128x128xf32> -> vector<128x128xf32>
    %18 = vector.broadcast %16 : vector<1x128xf32> to vector<128x128xf32>
    %19 = arith.addf %17, %18 : vector<128x128xf32>
    %20 = tpu.iota {dimensions = array<i32: 1>} : vector<128x128xi32>
    %c3_i32 = arith.constant 3 : i32
    %21 = vector.broadcast %c3_i32 : i32 to vector<128x128xi32>
    %22 = arith.cmpi eq, %20, %21 : vector<128x128xi32>
    %c5_i32 = arith.constant 5 : i32
    %23 = vector.broadcast %c5_i32 : i32 to vector<128x128xi32>
    %24 = arith.cmpi eq, %20, %23 : vector<128x128xi32>
    %c8_i32 = arith.constant 8 : i32
    %25 = vector.broadcast %c8_i32 : i32 to vector<128x128xi32>
    %26 = arith.cmpi eq, %20, %25 : vector<128x128xi32>
    %27 = arith.ori %22, %24 : vector<128x128xi1>
    %28 = arith.ori %27, %26 : vector<128x128xi1>
    %cst_17 = arith.constant 0.000000e+00 : f32
    %29 = vector.broadcast %cst_17 : f32 to vector<128x128xf32>
    %30 = arith.maximumf %19, %29 : vector<128x128xf32>
    %31 = vector.broadcast %cst_17 : f32 to vector<128x128xf32>
    %32 = arith.subf %19, %31 : vector<128x128xf32>
    %33 = arith.cmpf one, %32, %32 : vector<128x128xf32>
    %34 = vector.broadcast %cst_17 : f32 to vector<128x128xf32>
    %35 = arith.addf %19, %34 : vector<128x128xf32>
    %36 = math.absf %32 : vector<128x128xf32>
    %cst_18 = arith.constant 0.000000e+00 : f32
    %37 = vector.broadcast %cst_18 : f32 to vector<128x128xf32>
    %38 = arith.subf %37, %36 : vector<128x128xf32>
    %39 = math.exp %38 : vector<128x128xf32>
    %40 = math.log1p %39 : vector<128x128xf32>
    %41 = arith.addf %30, %40 : vector<128x128xf32>
    %42 = arith.select %33, %35, %41 : vector<128x128xi1>, vector<128x128xf32>
    %43 = arith.select %28, %42, %19 : vector<128x128xi1>, vector<128x128xf32>
    %c0_19 = arith.constant 0 : index
    %c0_20 = arith.constant 0 : index
    %44 = vector.load %arg8[%c0_19, %c0_20] : memref<128x384xf32, #tpu.memory_space<vmem>>, vector<128x384xf32>
    %cst_21 = arith.constant dense<0.000000e+00> : vector<128x384xf32>
    %45 = tpu.matmul %43, %44, %cst_21 {dimension_numbers = #tpu.dot_dimension_numbers<[1], [0], [0], [1], [0, 0, 1, 1], [], []>} : vector<128x128xf32>, vector<128x384xf32>, vector<128x384xf32> -> vector<128x384xf32>
    %c0_22 = arith.constant 0 : index
    %c0_23 = arith.constant 0 : index
    %46 = vector.load %arg9[%c0_22, %c0_23] : memref<128x384xf32, #tpu.memory_space<vmem>>, vector<128x384xf32>
    %cst_24 = arith.constant dense<0.000000e+00> : vector<128x384xf32>
    %47 = tpu.matmul %43, %46, %cst_24 {dimension_numbers = #tpu.dot_dimension_numbers<[1], [0], [0], [1], [0, 0, 1, 1], [], []>} : vector<128x128xf32>, vector<128x384xf32>, vector<128x384xf32> -> vector<128x384xf32>
    %48 = arith.mulf %45, %47 : vector<128x384xf32>
    %49 = vector.extract_strided_slice %48 {offsets = [0, 0], sizes = [128, 128], strides = [1, 1]} : vector<128x384xf32> to vector<128x128xf32>
    %50 = vector.extract_strided_slice %48 {offsets = [0, 128], sizes = [128, 128], strides = [1, 1]} : vector<128x384xf32> to vector<128x128xf32>
    %51 = arith.addf %49, %50 : vector<128x128xf32>
    %52 = vector.extract_strided_slice %48 {offsets = [0, 256], sizes = [128, 128], strides = [1, 1]} : vector<128x384xf32> to vector<128x128xf32>
    %53 = arith.addf %51, %52 : vector<128x128xf32>
    %c3_i32_25 = arith.constant 3 : i32
    %54 = vector.broadcast %c3_i32_25 : i32 to vector<128x128xi32>
    %55 = arith.cmpi slt, %20, %54 : vector<128x128xi32>
    %cst_26 = arith.constant 0.000000e+00 : f32
    %56 = vector.broadcast %cst_26 : f32 to vector<128x128xf32>
    %57 = arith.select %55, %19, %56 : vector<128x128xi1>, vector<128x128xf32>
    %58 = arith.addf %53, %57 : vector<128x128xf32>
    %c0_27 = arith.constant 0 : index
    %c0_28 = arith.constant 0 : index
    %59 = vector.load %arg10[%c0_27, %c0_28] : memref<128x128xf32, #tpu.memory_space<vmem>>, vector<128x128xf32>
    tpu.vector_store %arg10[%c0_27, %c0_28], %58 {strides = array<i32>} : memref<128x128xf32, #tpu.memory_space<vmem>>, vector<128x128xf32>,
    return
  }
  func.func @transform_0(%arg0: i32) -> (i32, i32) {
    %c0_i32 = arith.constant 0 : i32
    %c0_i32_0 = arith.constant 0 : i32
    return %arg0, %c0_i32 : i32, i32
  }
  func.func @transform_1(%arg0: i32) -> (i32, i32) {
    %c0_i32 = arith.constant 0 : i32
    %c0_i32_0 = arith.constant 0 : i32
    %c0_i32_1 = arith.constant 0 : i32
    return %c0_i32, %c0_i32_0 : i32, i32
  }
  func.func @transform_2(%arg0: i32) -> (i32, i32) {
    %c0_i32 = arith.constant 0 : i32
    %c0_i32_0 = arith.constant 0 : i32
    %c0_i32_1 = arith.constant 0 : i32
    return %c0_i32, %c0_i32_0 : i32, i32
  }
  func.func @transform_3(%arg0: i32) -> (i32, i32) {
    %c0_i32 = arith.constant 0 : i32
    %c0_i32_0 = arith.constant 0 : i32
    %c0_i32_1 = arith.constant 0 : i32
    return %c0_i32, %c0_i32_0 : i32, i32
  }
  func.func @transform_4(%arg0: i32) -> (i32, i32) {
    %c0_i32 = arith.constant 0 : i32
    %c0_i32_0 = arith.constant 0 : i32
    %c0_i32_1 = arith.constant 0 : i32
    return %c0_i32, %c0_i32_0 : i32, i32
  }
  func.func @transform_5(%arg0: i32) -> (i32, i32) {
    %c0_i32 = arith.constant 0 : i32
    %c0_i32_0 = arith.constant 0 : i32
    %c0_i32_1 = arith.constant 0 : i32
    return %c0_i32, %c0_i32_0 : i32, i32
  }
  func.func @transform_6(%arg0: i32) -> (i32, i32) {
    %c0_i32 = arith.constant 0 : i32
    %c0_i32_0 = arith.constant 0 : i32
    %c0_i32_1 = arith.constant 0 : i32
    return %c0_i32, %c0_i32_0 : i32, i32
  }
  func.func @transform_7(%arg0: i32) -> (i32, i32) {
    %c0_i32 = arith.constant 0 : i32
    %c0_i32_0 = arith.constant 0 : i32
    %c0_i32_1 = arith.constant 0 : i32
    return %c0_i32, %c0_i32_0 : i32, i32
  }
  func.func @transform_8(%arg0: i32) -> (i32, i32) {
    %c0_i32 = arith.constant 0 : i32
    %c0_i32_0 = arith.constant 0 : i32
    %c0_i32_1 = arith.constant 0 : i32
    return %c0_i32, %c0_i32_0 : i32, i32
  }
  func.func @transform_9(%arg0: i32) -> (i32, i32) {
    %c0_i32 = arith.constant 0 : i32
    %c0_i32_0 = arith.constant 0 : i32
    return %arg0, %c0_i32 : i32, i32
  }
}

</mosaic_0001>

<bundles_post_ra>
// kernel: tpu_custom_call.1
= control target key start
LH: loop header
LB: loop body
LE: loop exit
PB: predicated region body
PF: predicated region fallthrough
CT: control target
= control target key end

     0   :  { %s4671_s0 = inlined_call_operand.hbm [shape: f32[256,128], index: 0, kind: input, shape index: {}]   ;;  %s4672_s1 = inlined_call_operand.hbm [shape: f32[128,128], index: 1, kind: input, shape index: {}]   ;;  %s4673_s2 = inlined_call_operand.vmem [shape: f32[1,128], index: 2, kind: input, shape index: {}]   ;;  %s4674_s3 = inlined_call_operand.hbm [shape: f32[128,128], index: 3, kind: input, shape index: {}]   ;;  %s4675_s4 = inlined_call_operand.vmem [shape: f32[1,128], index: 4, kind: input, shape index: {}]   ;;  %s4676_s5 = inlined_call_operand.hbm [shape: f32[128,128], index: 5, kind: input, shape index: {}]   ;;  %s4677_s6 = inlined_call_operand.vmem [shape: f32[1,128], index: 6, kind: input, shape index: {}]   ;;  %s4678_s7 = inlined_call_operand.hbm [shape: f32[128,384], index: 7, kind: input, shape index: {}]   ;;  %s4679_s8 = inlined_call_operand.hbm [shape: f32[128,384], index: 8, kind: input, shape index: {}]   ;;  %s4680_s9 = inlined_call_operand.hbm [shape: f32[256,128], index: 9, kind: output, shape index: {}]  }
   0x1   :  { %4715 = sst [smem:[#allocation47_spill]] %s4680_s9 }
   0x2   :  { %14 = vsyncpa [#allocation3], 0 }
   0x3   :  { %16 = vsyncpa [#allocation3 + $0x1], 0 }
   0x4   :  { %17 = vsyncpa [#allocation6], 0 }
   0x5   :  { %18 = vsyncpa [#allocation9], 0 }
   0x6   :  { %19 = vsyncpa [#allocation12], 0 }
   0x7   :  { %20 = vsyncpa [#allocation4], 0 }
   0x8   :  { %22 = vsyncpa [#allocation4 + $0x1], 0  ;;  %s3436_s30 = smov 0   ;;  %s3438_s10 = smov 0  }
   0x9   :  { %s3440_s11 = smov 0   ;;  %s3442_s12 = smov 0  }
   0xa LB: > { %s3372_s13 = smov [#allocation5]   ;;  %s3457_s15 = sadd.s32 4294967295, %s3370_s12   ;;  %s3370_s12 = sphi %s3442_s12, %s4853_s12   ;;  %s3366_s11 = sphi %s3440_s11, %s4852_s11   ;;  %s3362_s10 = sphi %s3438_s10, %s4851_s10   ;;  %s3358_s30 = sphi %s3436_s30, %s4850_s30  }
   0xb   : > { %s265_s14 = sshll.u32 %s3372_s13, 4  ;;  %p2262_p0 = scmp.ge.s32.totalorder %s3370_s12, 1  ;;  %s3462_s14 = int_to_ptr.vmem [resolvable:$true] %s265_s14 }
   0xc   : > { %p4682_p1 = scmp.eq.s32.totalorder %s3457_s15, 0  ;;  %p253_p2 = scmp.lt.s32.totalorder %s3370_s12, 3 }
   0xd   : > { %s3373_s17 = smov [#allocation8]   ;;  %s3374_s20 = smov [#allocation7]  }
   0xe   : > { %p3464_p3 = pnand %p2262_p0, %p253_p2  ;;  %s297_s18 = sshll.u32 %s3373_s17, 4  ;;  %s3477_s18 = int_to_ptr.vmem [resolvable:$true] %s297_s18 }
   0xf   : > { %s281_s21 = sshll.u32 %s3374_s20, 4  ;;  %s3122_s24 = scalar_lea.hbm %s4672_s1, 2048  ;;  %s3479_s21 = int_to_ptr.vmem [resolvable:$true] %s281_s21 }
  0x10   : > { %s4716_s16 = scalar_select %p3464_p3, 1, 0 }
  0x11   : > { %p2978_p5 = pneg %p3464_p3  ;;  %p3123_p7 = scmp.ne.s32.totalorder %s4672_s1, %s3122_s24 }
  0x12   : > { %p3129_p11 = scmp.lt.u32.totalorder %s3122_s24, %s4672_s1 }
  0x13   : > { %p3473_p6 = pnand %p2978_p5, %p4682_p1 }
  0x15   : > { %p3489_p8 = pneg %p3473_p6 }
  0x17   : > { %p3125_p9 = pnand %p3489_p8, %p3123_p7 }
  0x19   : > { %p3126_p10 = pneg %p3125_p9 }
  0x1b   : > { %p3131_p12 = pnand %p3129_p11, %p3126_p10 }
  0x1d   : > { %3134 = shalt.err (!%p3131_p12)
}
  0x1e   : > { %s3135_s13 = scalar_lea.vmem %s3462_s14, 2048  ;;  %p3143_p5 = scmp.lt.s32.totalorder %s3462_s14, %s3462_s14 }
  0x1f   : > { %p3136_p13 = scmp.ne.s32.totalorder %s3462_s14, %s3135_s13  ;;  %p3144_p4 = scmp.lt.s32.totalorder %s3135_s13, %s3135_s13 }
  0x21   : > { %p3138_p0 = pnand %p3136_p13, %p3489_p8  ;;  %p3145_p7 = por %p3144_p4, %p3143_p5 }
  0x23   : > { %p3139_p2 = pneg %p3138_p0 }
  0x25   : > { %p3146_p9 = pnand %p3145_p7, %p3139_p2 }
  0x27   : > { %3149 = shalt.err (!%p3146_p9)
}
  0x28   : > { %s4684_s17 = smov 128   ;;  %s4685_s20 = smov 8  }
  0x29   : > { %2981 = dma.hbm_to_vmem [thread:$0]  (!%p3473_p6), %s4672_s1, 2048, %s3462_s14, [#allocation6], %s4684_s17, %s4684_s17, %s4685_s20  }
  0x2a   : > { %s3150_s26 = scalar_lea.hbm %s4676_s5, 2048 }
  0x2b   : > { %p3151_p4 = scmp.ne.s32.totalorder %s4676_s5, %s3150_s26  ;;  %p3157_p12 = scmp.lt.u32.totalorder %s3150_s26, %s4676_s5 }
  0x2d   : > { %p3153_p10 = pnand %p3151_p4, %p3489_p8 }
  0x2f   : > { %p3154_p11 = pneg %p3153_p10 }
  0x31   : > { %p3159_p13 = pnand %p3157_p12, %p3154_p11 }
  0x33   : > { %3162 = shalt.err (!%p3159_p13)
}
  0x34   : > { %s3163_s14 = scalar_lea.vmem %s3477_s18, 2048  ;;  %p3171_p7 = scmp.lt.s32.totalorder %s3477_s18, %s3477_s18 }
  0x35   : > { %p3164_p0 = scmp.ne.s32.totalorder %s3477_s18, %s3163_s14  ;;  %p3172_p9 = scmp.lt.s32.totalorder %s3163_s14, %s3163_s14 }
  0x37   : > { %p3166_p2 = pnand %p3164_p0, %p3489_p8  ;;  %p3173_p4 = por %p3172_p9, %p3171_p7 }
  0x39   : > { %p3167_p5 = pneg %p3166_p2 }
  0x3b   : > { %p3174_p10 = pnand %p3173_p4, %p3167_p5 }
  0x3d   : > { %3177 = shalt.err (!%p3174_p10)
}
  0x3e   : > { %2987 = dma.hbm_to_vmem [thread:$0]  (!%p3473_p6), %s4676_s5, 2048, %s3477_s18, [#allocation9], %s4684_s17, %s4684_s17, %s4685_s20  }
  0x3f   : > { %s3178_s25 = scalar_lea.hbm %s4674_s3, 2048 }
  0x40   : > { %p3179_p11 = scmp.ne.s32.totalorder %s4674_s3, %s3178_s25  ;;  %p3185_p0 = scmp.lt.u32.totalorder %s3178_s25, %s4674_s3 }
  0x42   : > { %p3181_p12 = pnand %p3179_p11, %p3489_p8 }
  0x44   : > { %p3182_p13 = pneg %p3181_p12 }
  0x46   : > { %p3187_p2 = pnand %p3185_p0, %p3182_p13 }
  0x48   : > { %3190 = shalt.err (!%p3187_p2)
}
  0x49   : > { %s3191_s18 = scalar_lea.vmem %s3479_s21, 2048  ;;  %p3199_p4 = scmp.lt.s32.totalorder %s3479_s21, %s3479_s21 }
  0x4a   : > { %p3192_p5 = scmp.ne.s32.totalorder %s3479_s21, %s3191_s18  ;;  %p3200_p10 = scmp.lt.s32.totalorder %s3191_s18, %s3191_s18 }
  0x4c   : > { %p3194_p7 = pnand %p3192_p5, %p3489_p8  ;;  %p3201_p11 = por %p3200_p10, %p3199_p4 }
  0x4e   : > { %p3195_p9 = pneg %p3194_p7 }
  0x50   : > { %p3202_p12 = pnand %p3201_p11, %p3195_p9 }
  0x52   : > { %3205 = shalt.err (!%p3202_p12)
}
  0x53   : > { %2984 = dma.hbm_to_vmem [thread:$0]  (!%p3473_p6), %s4674_s3, 2048, %s3479_s21, [#allocation6], %s4684_s17, %s4684_s17, %s4685_s20  }
  0x54   : > { %s3377_s22 = smov [#allocation10]   ;;  %s3206_s26 = scalar_lea.hbm %s4678_s7, 6144 }
  0x55   : > { %s313_s23 = sshll.u32 %s3377_s22, 4  ;;  %p3207_p13 = scmp.ne.s32.totalorder %s4678_s7, %s3206_s26  ;;  %s314_s23 = int_to_ptr.vmem [resolvable:$true] %s313_s23 }
  0x56   : > { %p3213_p5 = scmp.lt.u32.totalorder %s3206_s26, %s4678_s7 }
  0x57   : > { %p3209_p0 = pnand %p3207_p13, %p3489_p8 }
  0x59   : > { %p3210_p2 = pneg %p3209_p0 }
  0x5b   : > { %p3215_p7 = pnand %p3213_p5, %p3210_p2 }
  0x5d   : > { %3218 = shalt.err (!%p3215_p7)
}
  0x5e   : > { %s3219_s21 = scalar_lea.vmem %s314_s23, 6144  ;;  %p3227_p11 = scmp.lt.s32.totalorder %s314_s23, %s314_s23 }
  0x5f   : > { %p3220_p9 = scmp.ne.s32.totalorder %s314_s23, %s3219_s21  ;;  %p3228_p12 = scmp.lt.s32.totalorder %s3219_s21, %s3219_s21 }
  0x61   : > { %p3222_p4 = pnand %p3220_p9, %p3489_p8  ;;  %p3229_p1 = por %p3228_p12, %p3227_p11 }
  0x63   : > { %p3223_p10 = pneg %p3222_p4 }
  0x65   : > { %p3230_p3 = pnand %p3229_p1, %p3223_p10 }
  0x67   : > { %3233 = shalt.err (!%p3230_p3)
}
  0x68   : > { %s3378_s14 = smov 384   ;;  %s3379_s9 = smov 24  }
  0x69   : > { %2990 = dma.hbm_to_vmem [thread:$0]  (!%p3473_p6), %s4678_s7, 6144, %s314_s23, [#allocation9], %s3378_s14, %s3378_s14, %s3379_s9  }
  0x6a   : > { %s3380_s25 = smov [#allocation11]   ;;  %s3234_s13 = scalar_lea.hbm %s4679_s8, 6144 }
  0x6b   : > { %s326_s26 = sshll.u32 %s3380_s25, 4  ;;  %p3235_p1 = scmp.ne.s32.totalorder %s4679_s8, %s3234_s13  ;;  %s327_s26 = int_to_ptr.vmem [resolvable:$true] %s326_s26 }
  0x6c   : > { %p3241_p0 = scmp.lt.u32.totalorder %s3234_s13, %s4679_s8 }
  0x6d   : > { %p3237_p3 = pnand %p3235_p1, %p3489_p8 }
  0x6f   : > { %p3238_p13 = pneg %p3237_p3 }
  0x71   : > { %p3243_p2 = pnand %p3241_p0, %p3238_p13 }
  0x73   : > { %3246 = shalt.err (!%p3243_p2)
}
  0x74   : > { %s3247_s23 = scalar_lea.vmem %s327_s26, 6144  ;;  %p3255_p4 = scmp.lt.s32.totalorder %s327_s26, %s327_s26 }
  0x75   : > { %p3248_p5 = scmp.ne.s32.totalorder %s327_s26, %s3247_s23  ;;  %p3256_p10 = scmp.lt.s32.totalorder %s3247_s23, %s3247_s23 }
  0x77   : > { %p3250_p7 = pnand %p3248_p5, %p3489_p8  ;;  %p3257_p11 = por %p3256_p10, %p3255_p4 }
  0x79   : > { %p3251_p9 = pneg %p3250_p7 }
  0x7b   : > { %p3258_p12 = pnand %p3257_p11, %p3251_p9 }
  0x7d   : > { %3261 = shalt.err (!%p3258_p12)
}
  0x7e   : > { %2993 = dma.hbm_to_vmem [thread:$0]  (!%p3473_p6), %s4679_s8, 6144, %s327_s26, [#allocation12], %s3378_s14, %s3378_s14, %s3379_s9  }
  0x7f   : > { %s2261_s27 = sadd.s32 4294967294, %s3370_s12   ;;  %s3603_s19 = sadd.s32 1, %s3370_s12  }
  0x80   : > { %s35_s17 = sadd.s32 1, %s3366_s11  ;;  %s32_s20 = ssub.s32 %s3370_s12, %s3603_s19 }
  0x81   : > { %p42_p8 = scmp.ne.s32.totalorder %s3366_s11, %s3362_s10  ;;  %p33_p1 = scmp.eq.s32.totalorder %s32_s20, 0 }
  0x82   : > { %p43_p3 = scmp.eq.s32.totalorder %s3370_s12, 0  ;;  %p48_p13 = scmp.ne.s32.totalorder %s3362_s10, %s3358_s30 }
  0x83   : > { %p240_p0 = scmp.eq.s32.totalorder %s3457_s15, 1  ;;  %p4719_p5 = scmp.eq.s32.totalorder %s3457_s15, 0 }
  0x84   : > { %s3615_s25 = scalar_select %p33_p1, %s3366_s11, %s35_s17  }
  0x85   : > { %p44_p2 = por %p43_p3, %p42_p8  ;;  %p3619_p7 = por %p4719_p5, %p48_p13 }
  0x86   : > { %p3623_p6 = por %p240_p0, %p42_p8  ;;  %p246_p9 = scmp.eq.s32.totalorder %s2261_s27, 1 }
  0x87   : > { %p3007_p4 = scmp.lt.s32.totalorder %s3370_s12, 2  ;;  %s340_s9 = sand.u32 1, %s3366_s11  }
  0x88   : > { %s4721_s14 = scalar_select %p3623_p6, 1, 0 }
  0x89   : > { %p3629_p10 = por %p246_p9, %p48_p13  ;;  %s2269_s29 = sshll.u32 %s340_s9, 7 }
  0x8a   : > { %s2288_s13 = sshll.u32 %s3370_s12, 11  ;;  %s344_s22 = scalar_lea.vmem [#allocation2], %s2269_s29 }
  0x8b   : > { %s4722_s26 = scalar_select %p3629_p10, 1, 0 }
  0x8c   : > { %s3637_s23 = scalar_lea.hbm %s4671_s0, %s2288_s13  ;;  %s351_s24 = sshll.u32 %s344_s22, 4  ;;  %s3643_s24 = int_to_ptr.vmem [resolvable:$true] %s351_s24 }
  0x8d   : > { %p3639_p11 = pnand %p3007_p4, %p44_p2  ;;  %s3645_s17 = scalar_lea.sflag [#allocation3], %s340_s9 }
  0x8e   : > { %s3262_s20 = scalar_lea.hbm %s3637_s23, 2048  ;;  %s3267_s18 = scalar_lea.hbm %s4671_s0, 4096 }
  0x8f   : > { %p3263_p12 = scmp.ne.s32.totalorder %s3637_s23, %s3262_s20  ;;  %p3264_p8 = pneg %p3639_p11 }
  0x90   : > { %p3268_p13 = scmp.lt.u32.totalorder %s3637_s23, %s4671_s0  ;;  %p3269_p0 = scmp.lt.u32.totalorder %s3267_s18, %s3262_s20 }
  0x91   : > { %p3265_p1 = pnand %p3264_p8, %p3263_p12  ;;  %p3271_p5 = scmp.lt.u32.totalorder %s3262_s20, %s3637_s23 }
  0x92   : > { %p3270_p2 = por %p3269_p0, %p3268_p13 }
  0x93   : > { %p3266_p3 = pneg %p3265_p1 }
  0x94   : > { %p3272_p9 = por %p3271_p5, %p3270_p2 }
  0x96   : > { %p3273_p4 = pnand %p3272_p9, %p3266_p3 }
  0x98   : > { %3276 = shalt.err (!%p3273_p4)
}
  0x99   : > { %s3277_s9 = scalar_lea.vmem %s3643_s24, 2048  ;;  %s3381_s29 = smov [#allocation2]  }
  0x9a   : > { %p3278_p12 = scmp.ne.s32.totalorder %s3643_s24, %s3277_s9  ;;  %s3282_s13 = sshll.u32 %s3381_s29, 4  ;;  %s3283_s13 = int_to_ptr.vmem [resolvable:$false] %s3282_s13 }
  0x9b   : > { %s3284_s21 = scalar_lea.vmem %s3283_s13, 4096  ;;  %p3285_p6 = scmp.lt.s32.totalorder %s3643_s24, %s3283_s13 }
  0x9c   : > { %p3280_p1 = pnand %p3278_p12, %p3264_p8  ;;  %p3286_p13 = scmp.lt.s32.totalorder %s3284_s21, %s3277_s9 }
  0x9e   : > { %p3281_p10 = pneg %p3280_p1  ;;  %p3287_p0 = por %p3286_p13, %p3285_p6 }
  0xa0   : > { %p3288_p2 = pnand %p3287_p0, %p3281_p10 }
  0xa2   : > { %3291 = shalt.err (!%p3288_p2)
}
  0xa3   : > { %s4724_s20 = smov 8   ;;  %s4725_s18 = smov 128  }
  0xa4   : > { %2997 = dma.hbm_to_vmem [thread:$0]  (!%p3639_p11), %s3637_s23, 2048, %s3643_s24, %s3645_s17, %s4725_s18, %s4725_s18, %s4724_s20  }
  0xa5   : > { %p4726_p8 = scmp.ne.s32.totalorder %s4716_s16, 0 }
  0xa7   : > { %363 = sbr.rel (%p4726_p8) target bundleno = 1268 (0x4f4), region = 56 }
  0xae   : > { %s3679_s22 = sand.u32 1, %s3362_s10  }
  0xaf   : > { %s2273_s9 = sshll.u32 %s3679_s22, 7  ;;  %s366_s29 = scalar_lea.sflag [#allocation3], %s3679_s22 }
  0xb0   : > { %s3685_s27 = scalar_lea.vmem [#allocation2], %s2273_s9 }
  0xb1   : > { %3337 = dma.done.wait (%p3619_p7), %s366_s29, 2048  }
  0xb2   : > { %3339 = vsyncadd (%p3619_p7), %s366_s29, 4294965248  ;;  %p4727_p6 = scmp.eq.s32.totalorder %s3457_s15, 0 }
  0xb4   : > { %3341 = dma.done.wait (%p4727_p6), [#allocation6], 4096   ;;  %p4728_p10 = pmov %p4727_p6 }
  0xb5   : > { %p4729_p11 = pmov %p4727_p6 }
  0xb6   : > { %3343 = vsyncadd (%p4728_p10), [#allocation6], 4294963200 }
  0xb7   : > { %3345 = dma.done.wait (%p4729_p11), [#allocation9], 8192   ;;  %p4730_p3 = pmov %p4727_p6 }
  0xb9   : > { %3347 = vsyncadd (%p4730_p3), [#allocation9], 4294959104  ;;  %p4731_p5 = pmov %p4730_p3 }
  0xba   : > { %p4732_p9 = pmov %p4730_p3 }
  0xbb   : > { %3349 = dma.done.wait (%p4731_p5), [#allocation12], 6144  }
  0xbc   : > { %3351 = vsyncadd (%p4732_p9), [#allocation12], 4294961152  ;;  %v442_v0 = vld [vmem:[#allocation5] sm:$0xff]  ;;  %v443_v1 = vld [vmem:[#allocation5 + $0x8] sm:$0xff]  ;;  %s4552_s21 = scalar_lea.vmem [#allocation13], %s2273_s9  ;;  %s2289_s20 = sshll.u32 %s3457_s15, 11 }
  0xbd   : > { %v444_v2 = vld [vmem:[#allocation5 + $0x10] sm:$0xff]  ;;  %v2730_v3 = vpack.c.bf16 %v443_v1, %v442_v0  ;;  %v445_v4 = vld [vmem:[#allocation5 + $0x18] sm:$0xff]  ;;  %v446_v6 = vld [vmem:[#allocation5 + $0x20] sm:$0xff]  ;;  %s2140_s18 = sshll.u32 %s4552_s21, 4  ;;  %s2127_s28 = scalar_lea.sflag [#allocation4], %s3679_s22  ;;  %s4625_s18 = int_to_ptr.vmem [resolvable:$true] %s2140_s18 }
  0xbe   : > { %v2734_v5 = vpack.c.bf16 %v445_v4, %v444_v2  ;;  %v447_v7 = vld [vmem:[#allocation5 + $0x28] sm:$0xff]  ;;  %v426_v9 = vld [vmem:[%s3685_s27] sm:$0xff]  ;;  %v448_v10 = vld [vmem:[#allocation5 + $0x30] sm:$0xff]  ;;  %s3292_s23 = scalar_lea.vmem %s4625_s18, 2048  ;;  %p4847_p4 = scmp.ne.s32.totalorder %s4721_s14, 0 }
  0xbf   : > { %2731 = vmatprep.subr.bf16.mxu0 %v2730_v3  ;;  %v2738_v8 = vpack.c.bf16 %v447_v7, %v446_v6  ;;  %v449_v11 = vld [vmem:[#allocation5 + $0x38] sm:$0xff]  ;;  %2482 = vmatprep.mubr.f32.mxu0 %v426_v9  ;;  %v450_v13 = vld [vmem:[#allocation5 + $0x40] sm:$0xff]  ;;  %v451_v14 = vld [vmem:[#allocation5 + $0x48] sm:$0xff]  ;;  %p3293_p7 = scmp.ne.s32.totalorder %s4625_s18, %s3292_s23  ;;  %s3383_s15 = smov [#allocation13]  }
  0xc0   : > { %2733 = vmatpush3.bf16.msra.mxu0 %v2730_v3  ;;  %v2742_v12 = vpack.c.bf16 %v449_v11, %v448_v10  ;;  %v626_v15 = vld [vmem:[#allocation7] sm:$0xff]  ;;  %v627_v16 = vld [vmem:[#allocation7 + $0x8] sm:$0xff]  ;;  %v628_v17 = vld [vmem:[#allocation7 + $0x10] sm:$0xff]  ;;  %v2746_v21 = vpack.c.bf16 %v451_v14, %v450_v13  ;;  %s3296_s24 = sshll.u32 %s3383_s15, 4  ;;  %s3297_s24 = int_to_ptr.vmem [resolvable:$false] %s3296_s24 }
  0xc1   : > { %2735 = vmatprep.subr.bf16.mxu0 %v2734_v5  ;;  %v629_v18 = vld [vmem:[#allocation7 + $0x18] sm:$0xff]  ;;  %v2762_v19 = vpack.c.bf16 %v627_v16, %v626_v15  ;;  %v630_v22 = vld [vmem:[#allocation7 + $0x20] sm:$0xff]  ;;  %v631_v23 = vld [vmem:[#allocation7 + $0x28] sm:$0xff]  ;;  %p3294_p12 = pnand %p3293_p7, %p4847_p4  ;;  %s3298_s17 = scalar_lea.vmem %s3297_s24, 4096 }
  0xc2   : > { %v2766_v20 = vpack.c.bf16 %v629_v18, %v628_v17  ;;  %v452_v24 = vld [vmem:[#allocation5 + $0x50] sm:$0xff]  ;;  %v453_v25 = vld [vmem:[#allocation5 + $0x58] sm:$0xff]  ;;  %v2770_v26 = vpack.c.bf16 %v631_v23, %v630_v22  ;;  %v454_v30 = vld [vmem:[#allocation5 + $0x60] sm:$0xff]  ;;  %p3299_p13 = scmp.lt.s32.totalorder %s4625_s18, %s3297_s24  ;;  %p3300_p0 = scmp.lt.s32.totalorder %s3298_s17, %s3292_s23 }
  0xc3   : > { %2763 = vmatprep.subr.bf16.mxu1 %v2762_v19  ;;  %v2750_v27 = vpack.c.bf16 %v453_v25, %v452_v24  ;;  %v632_v28 = vld [vmem:[#allocation7 + $0x30] sm:$0xff]  ;;  %v633_v29 = vld [vmem:[#allocation7 + $0x38] sm:$0xff]  ;;  %v455_v31 = vld [vmem:[#allocation5 + $0x68] sm:$0xff]  ;;  %p3295_p1 = pneg %p3294_p12 }
  0xc4   : > { %2737 = vmatpush3.bf16.msra.mxu0 %v2734_v5  ;;  %2765 = vmatpush3.bf16.msra.mxu1 %v2762_v19  ;;  %v2774_v32 = vpack.c.bf16 %v633_v29, %v632_v28  ;;  %v2754_v33 = vpack.c.bf16 %v455_v31, %v454_v30  ;;  %v634_v34 = vld [vmem:[#allocation7 + $0x40] sm:$0xff]  ;;  %v635_v35 = vld [vmem:[#allocation7 + $0x48] sm:$0xff]  ;;  %v456_v36 = vld [vmem:[#allocation5 + $0x70] sm:$0xff]  ;;  %p3301_p2 = por %p3300_p0, %p3299_p13 }
  0xc5   : > { %2739 = vmatprep.subr.bf16.mxu0 %v2738_v8  ;;  %2767 = vmatprep.subr.bf16.mxu1 %v2766_v20  ;;  %v457_v37 = vld [vmem:[#allocation5 + $0x78] sm:$0xff]  ;;  %v2778_v38 = vpack.c.bf16 %v635_v35, %v634_v34  ;;  %v636_v40 = vld [vmem:[#allocation7 + $0x50] sm:$0xff]  ;;  %v638_v43 = vld [vmem:[#allocation7 + $0x60] sm:$0xff] }
  0xc6   : > { %v2758_v39 = vpack.c.bf16 %v457_v37, %v456_v36  ;;  %v637_v41 = vld [vmem:[#allocation7 + $0x58] sm:$0xff]  ;;  %v639_v44 = vld [vmem:[#allocation7 + $0x68] sm:$0xff]  ;;  %v428_v47 = vld [vmem:[%s3685_s27 + $0x10] sm:$0xff]  ;;  %p3302_p8 = pnand %p3301_p2, %p3295_p1 }
  0xc7   : > { %v2782_v42 = vpack.c.bf16 %v637_v41, %v636_v40  ;;  %v427_v45 = vld [vmem:[%s3685_s27 + $0x8] sm:$0xff]  ;;  %v2786_v46 = vpack.c.bf16 %v639_v44, %v638_v43  ;;  %v429_v48 = vld [vmem:[%s3685_s27 + $0x18] sm:$0xff]  ;;  %v430_v49 = vld [vmem:[%s3685_s27 + $0x20] sm:$0xff] }
  0xc8   : > { %2741 = vmatpush3.bf16.msra.mxu0 %v2738_v8  ;;  %2769 = vmatpush3.bf16.msra.mxu1 %v2766_v20  ;;  %v431_v50 = vld [vmem:[%s3685_s27 + $0x28] sm:$0xff]  ;;  %v432_v51 = vld [vmem:[%s3685_s27 + $0x30] sm:$0xff]  ;;  %v433_v52 = vld [vmem:[%s3685_s27 + $0x38] sm:$0xff] }
  0xc9   : > { %2743 = vmatprep.subr.bf16.mxu0 %v2742_v12  ;;  %2771 = vmatprep.subr.bf16.mxu1 %v2770_v26  ;;  %v434_v53 = vld [vmem:[%s3685_s27 + $0x40] sm:$0xff]  ;;  %v435_v54 = vld [vmem:[%s3685_s27 + $0x48] sm:$0xff]  ;;  %v436_v55 = vld [vmem:[%s3685_s27 + $0x50] sm:$0xff] }
  0xca   : > { %v437_v56 = vld [vmem:[%s3685_s27 + $0x58] sm:$0xff]  ;;  %v438_v57 = vld [vmem:[%s3685_s27 + $0x60] sm:$0xff]  ;;  %v439_v58 = vld [vmem:[%s3685_s27 + $0x68] sm:$0xff] }
  0xcb   : > { %v440_v59 = vld [vmem:[%s3685_s27 + $0x70] sm:$0xff]  ;;  %v441_v60 = vld [vmem:[%s3685_s27 + $0x78] sm:$0xff]  ;;  %v810_v0 = vld [vmem:[#allocation8] sm:$0xff]  ;;  %s4845_s27 = sld [smem:[#allocation47_spill]] }
  0xcc   : > { %2745 = vmatpush3.bf16.msra.mxu0 %v2742_v12  ;;  %2773 = vmatpush3.bf16.msra.mxu1 %v2770_v26  ;;  %v640_v61 = vld [vmem:[#allocation7 + $0x70] sm:$0xff]  ;;  %v641_v62 = vld [vmem:[#allocation7 + $0x78] sm:$0xff]  ;;  %v811_v1 = vld [vmem:[#allocation8 + $0x8] sm:$0xff] }
  0xcd   : > { %2747 = vmatprep.subr.bf16.mxu0 %v2746_v21  ;;  %2775 = vmatprep.subr.bf16.mxu1 %v2774_v32  ;;  %v2790_v63 = vpack.c.bf16 %v641_v62, %v640_v61  ;;  %v812_v2 = vld [vmem:[#allocation8 + $0x10] sm:$0xff]  ;;  %v2794_v3 = vpack.c.bf16 %v811_v1, %v810_v0  ;;  %v813_v4 = vld [vmem:[#allocation8 + $0x18] sm:$0xff]  ;;  %v814_v6 = vld [vmem:[#allocation8 + $0x20] sm:$0xff] }
  0xce   : > { %v2798_v5 = vpack.c.bf16 %v813_v4, %v812_v2  ;;  %v815_v7 = vld [vmem:[#allocation8 + $0x28] sm:$0xff]  ;;  %v816_v9 = vld [vmem:[#allocation8 + $0x30] sm:$0xff]  ;;  %v817_v10 = vld [vmem:[#allocation8 + $0x38] sm:$0xff] }
  0xcf   : > { %v2802_v8 = vpack.c.bf16 %v815_v7, %v814_v6  ;;  %v2806_v11 = vpack.c.bf16 %v817_v10, %v816_v9  ;;  %v818_v12 = vld [vmem:[#allocation8 + $0x40] sm:$0xff]  ;;  %v819_v13 = vld [vmem:[#allocation8 + $0x48] sm:$0xff]  ;;  %v820_v15 = vld [vmem:[#allocation8 + $0x50] sm:$0xff] }
  0xd0   : > { %2749 = vmatpush3.bf16.msra.mxu0 %v2746_v21  ;;  %2777 = vmatpush3.bf16.msra.mxu1 %v2774_v32  ;;  %v2810_v14 = vpack.c.bf16 %v819_v13, %v818_v12  ;;  %v821_v16 = vld [vmem:[#allocation8 + $0x58] sm:$0xff]  ;;  %v822_v18 = vld [vmem:[#allocation8 + $0x60] sm:$0xff]  ;;  %v823_v19 = vld [vmem:[#allocation8 + $0x68] sm:$0xff] }
  0xd1   : > { %2751 = vmatprep.subr.bf16.mxu0 %v2750_v27  ;;  %2779 = vmatprep.subr.bf16.mxu1 %v2778_v38  ;;  %v2814_v17 = vpack.c.bf16 %v821_v16, %v820_v15  ;;  %v2818_v20 = vpack.c.bf16 %v823_v19, %v822_v18  ;;  %v2280_v21 = vld [vmem:[%s4673_s2] ss:$0 sm:$0xff]  ;;  %v824_v6 = vld [vmem:[#allocation8 + $0x70] sm:$0xff]  ;;  %v825_v7 = vld [vmem:[#allocation8 + $0x78] sm:$0xff]  ;;  %s4623_s16 = scalar_lea.hbm %s4845_s27, %s2289_s20 }
  0xd2   : > { %v2281_v9 = vld [vmem:[%s4675_s4] ss:$0 sm:$0xff] }
  0xd4   : > { %2753 = vmatpush3.bf16.msra.mxu0 %v2750_v27  ;;  %2781 = vmatpush3.bf16.msra.mxu1 %v2778_v38 }
  0xd5   : > { %2755 = vmatprep.subr.bf16.mxu0 %v2754_v33  ;;  %2783 = vmatprep.subr.bf16.mxu1 %v2782_v42 }
  0xd8   : > { %2757 = vmatpush3.bf16.msra.mxu0 %v2754_v33  ;;  %2785 = vmatpush3.bf16.msra.mxu1 %v2782_v42 }
  0xd9   : > { %2759 = vmatprep.subr.bf16.mxu0 %v2758_v39  ;;  %2787 = vmatprep.subr.bf16.mxu1 %v2786_v46 }
  0xdc   : > { %2761 = vmatpush3.bf16.msra.mxu0 %v2758_v39  ;;  %2789 = vmatpush3.bf16.msra.mxu1 %v2786_v46 }
  0xdd   : > { %2791 = vmatprep.subr.bf16.mxu1 %v2790_v63  ;;  %2795 = vmatprep.subr.bf16.mxu0 %v2794_v3 }
  0xdf   : > { %2483 = vmatmul.mubr.f32.vlgmr.msra.gmra.mrb[0].mxu0 %v427_v45 }
  0xe0   : > { %2485 = vmatprep.mubr.f32.mxu0 %v428_v47  ;;  %2793 = vmatpush3.bf16.msra.mxu1 %v2790_v63 }
  0xe1   : > { %2797 = vmatpush3.bf16.msra.mxu0 %v2794_v3 }
  0xe2   : > { %2799 = vmatprep.subr.bf16.mxu0 %v2798_v5 }
  0xe3   : > { %2486 = vmatmul.mubr.f32.gmra.mrb[2].mxu0 %v429_v48 }
  0xe4   : > { %2488 = vmatprep.mubr.f32.mxu0 %v430_v49 }
  0xe5   : > { %2801 = vmatpush3.bf16.msra.mxu0 %v2798_v5 }
  0xe6   : > { %2803 = vmatprep.subr.bf16.mxu0 %v2802_v8 }
  0xe7   : > { %2489 = vmatmul.mubr.f32.gmra.mrb[4].mxu0 %v431_v50 }
  0xe8   : > { %2491 = vmatprep.mubr.f32.mxu0 %v432_v51 }
  0xe9   : > { %2805 = vmatpush3.bf16.msra.mxu0 %v2802_v8  ;;  %v2822_v8 = vpack.c.bf16 %v825_v7, %v824_v6  ;;  %v1297_v6 = vld [vmem:[#allocation10 + $0x40] sm:$0xff]  ;;  %v1300_v7 = vld [vmem:[#allocation10 + $0x58] sm:$0xff] }
  0xea   : > { %2807 = vmatprep.subr.bf16.mxu0 %v2806_v11 }
  0xeb   : > { %2492 = vmatmul.mubr.f32.gmra.mrb[6].mxu0 %v433_v52 }
  0xec   : > { %2494 = vmatprep.mubr.f32.mxu0 %v434_v53 }
  0xed   : > { %2809 = vmatpush3.bf16.msra.mxu0 %v2806_v11 }
  0xee   : > { %2811 = vmatprep.subr.bf16.mxu0 %v2810_v14 }
  0xef   : > { %2495 = vmatmul.mubr.f32.gmra.mrb[8].mxu0 %v435_v54 }
  0xf0   : > { %2497 = vmatprep.mubr.f32.mxu0 %v436_v55 }
  0xf1   : > { %2813 = vmatpush3.bf16.msra.mxu0 %v2810_v14 }
  0xf2   : > { %2815 = vmatprep.subr.bf16.mxu0 %v2814_v17 }
  0xf3   : > { %2498 = vmatmul.mubr.f32.gmra.mrb[10].mxu0 %v437_v56 }
  0xf4   : > { %2500 = vmatprep.mubr.f32.mxu0 %v438_v57 }
  0xf5   : > { %2817 = vmatpush3.bf16.msra.mxu0 %v2814_v17 }
  0xf6   : > { %2819 = vmatprep.subr.bf16.mxu0 %v2818_v20 }
  0xf7   : > { %2501 = vmatmul.mubr.f32.gmra.mrb[12].mxu0 %v439_v58 }
  0xf8   : > { %2503 = vmatprep.mubr.f32.mxu0 %v440_v59 }
  0xf9   : > { %2821 = vmatpush3.bf16.msra.mxu0 %v2818_v20 }
  0xfa   : > { %2823 = vmatprep.subr.bf16.mxu0 %v2822_v8 }
  0xfb   : > { %2504 = vmatmul.mubr.f32.gmra.mrb[14].mxu0 %v441_v60 }
  0xfd   : > { %2825 = vmatpush3.bf16.msra.mxu0 %v2822_v8  ;;  %v1295_v8 = vld [vmem:[#allocation10 + $0x30] sm:$0xff] }
 0x1b2   : > { %v2484_v22 = vpop.f32.mrb[0].mxu0 }
 0x1b3   : > { %v537_v23 = vadd.f32 %v2484_v22, %v2280_v21  ;;  %v531_v24 = vpop.f32.mrb[1].mxu0 }
 0x1b4   : > { %v532_v25 = vadd.f32 %v2280_v21, %v531_v24 }
 0x1b5   : > { %v611_v28 = vmax.f32 %v537_v23, 0.0 }
 0x1b6   : > { %v2487_v26 = vpop.f32.mrb[2].mxu0  ;;  %v610_v27 = vmax.f32 %v532_v25, 0.0 }
 0x1b7   : > { %v547_v29 = vadd.f32 %v2487_v26, %v2280_v21  ;;  %v541_v30 = vpop.f32.mrb[3].mxu0 }
 0x1b8   : > { %v542_v31 = vadd.f32 %v2280_v21, %v541_v30  ;;  %2538 = vmatprep.mubr.f32.mxu1 %v610_v27 }
 0x1b9   : > { %2539 = vmatmul.mubr.f32.vlgmr.msra.gmra.mrb[0].mxu1 %v611_v28  ;;  %v613_v34 = vmax.f32 %v547_v29, 0.0 }
 0x1ba   : > { %v612_v32 = vmax.f32 %v542_v31, 0.0  ;;  %v2490_v33 = vpop.f32.mrb[4].mxu0 }
 0x1bb   : > { %v557_v35 = vadd.f32 %v2490_v33, %v2280_v21  ;;  %v551_v36 = vpop.f32.mrb[5].mxu0 }
 0x1bc   : > { %v552_v37 = vadd.f32 %v2280_v21, %v551_v36  ;;  %2541 = vmatprep.mubr.f32.mxu1 %v612_v32 }
 0x1bd   : > { %2542 = vmatmul.mubr.f32.gmra.mrb[2].mxu1 %v613_v34  ;;  %v615_v40 = vmax.f32 %v557_v35, 0.0 }
 0x1be   : > { %v614_v38 = vmax.f32 %v552_v37, 0.0  ;;  %v2493_v39 = vpop.f32.mrb[6].mxu0 }
 0x1bf   : > { %v567_v41 = vadd.f32 %v2493_v39, %v2280_v21  ;;  %v561_v42 = vpop.f32.mrb[7].mxu0 }
 0x1c0   : > { %v562_v43 = vadd.f32 %v2280_v21, %v561_v42  ;;  %2544 = vmatprep.mubr.f32.mxu1 %v614_v38 }
 0x1c1   : > { %2545 = vmatmul.mubr.f32.gmra.mrb[4].mxu1 %v615_v40  ;;  %v617_v46 = vmax.f32 %v567_v41, 0.0 }
 0x1c2   : > { %v616_v44 = vmax.f32 %v562_v43, 0.0  ;;  %v2496_v45 = vpop.f32.mrb[8].mxu0 }
 0x1c3   : > { %v577_v47 = vadd.f32 %v2496_v45, %v2280_v21  ;;  %v571_v48 = vpop.f32.mrb[9].mxu0 }
 0x1c4   : > { %v572_v49 = vadd.f32 %v2280_v21, %v571_v48  ;;  %2547 = vmatprep.mubr.f32.mxu1 %v616_v44 }
 0x1c5   : > { %2548 = vmatmul.mubr.f32.gmra.mrb[6].mxu1 %v617_v46  ;;  %v619_v52 = vmax.f32 %v577_v47, 0.0 }
 0x1c6   : > { %v618_v50 = vmax.f32 %v572_v49, 0.0  ;;  %v2499_v51 = vpop.f32.mrb[10].mxu0 }
 0x1c7   : > { %v587_v53 = vadd.f32 %v2499_v51, %v2280_v21  ;;  %v581_v54 = vpop.f32.mrb[11].mxu0 }
 0x1c8   : > { %v582_v55 = vadd.f32 %v2280_v21, %v581_v54  ;;  %2550 = vmatprep.mubr.f32.mxu1 %v618_v50 }
 0x1c9   : > { %2551 = vmatmul.mubr.f32.gmra.mrb[8].mxu1 %v619_v52  ;;  %v621_v58 = vmax.f32 %v587_v53, 0.0 }
 0x1ca   : > { %v620_v56 = vmax.f32 %v582_v55, 0.0  ;;  %v2502_v57 = vpop.f32.mrb[12].mxu0 }
 0x1cb   : > { %v597_v59 = vadd.f32 %v2502_v57, %v2280_v21  ;;  %v591_v60 = vpop.f32.mrb[13].mxu0 }
 0x1cc   : > { %v592_v61 = vadd.f32 %v2280_v21, %v591_v60  ;;  %2553 = vmatprep.mubr.f32.mxu1 %v620_v56 }
 0x1cd   : > { %2554 = vmatmul.mubr.f32.gmra.mrb[10].mxu1 %v621_v58  ;;  %v623_v0 = vmax.f32 %v597_v59, 0.0  ;;  %v1290_v58 = vld [vmem:[#allocation10 + $0x8] sm:$0xff]  ;;  %v1293_v59 = vld [vmem:[#allocation10 + $0x20] sm:$0xff] }
 0x1ce   : > { %v622_v62 = vmax.f32 %v592_v61, 0.0  ;;  %v2505_v63 = vpop.f32.mrb[14].mxu0  ;;  %v2826_v60 = vpack.c.bf16 %v1293_v59, %v1290_v58  ;;  %v1291_v61 = vld [vmem:[#allocation10 + $0x10] sm:$0xff] }
 0x1cf   : > { %v607_v1 = vadd.f32 %v2505_v63, %v2280_v21  ;;  %v601_v2 = vpop.f32.mrb[15].mxu0  ;;  %v1289_v63 = vld [vmem:[#allocation10] sm:$0xff]  ;;  %v1335_v58 = vld [vmem:[#allocation10 + $0x170] sm:$0xff] }
 0x1d0   : > { %v602_v3 = vadd.f32 %v2280_v21, %v601_v2  ;;  %2556 = vmatprep.mubr.f32.mxu1 %v622_v62  ;;  %v1294_v62 = vld [vmem:[#allocation10 + $0x28] sm:$0xff]  ;;  %2827 = vmatprep.subr.bf16.mxu1 %v2826_v60  ;;  %v1333_v60 = vld [vmem:[#allocation10 + $0x160] sm:$0xff] }
 0x1d1   : > { %2557 = vmatmul.mubr.f32.gmra.mrb[12].mxu1 %v623_v0  ;;  %v625_v5 = vmax.f32 %v607_v1, 0.0  ;;  %v2858_v0 = vpack.c.bf16 %v1294_v62, %v1291_v61  ;;  %v1292_v1 = vld [vmem:[#allocation10 + $0x18] sm:$0xff]  ;;  %v1331_v62 = vld [vmem:[#allocation10 + $0x150] sm:$0xff] }
 0x1d2   : > { %v624_v4 = vmax.f32 %v602_v3, 0.0  ;;  %v2828_v2 = vpack.c.bf16 %v1292_v1, %v1289_v63  ;;  %v1296_v3 = vld [vmem:[#allocation10 + $0x38] sm:$0xff] }
 0x1d3   : > { %2859 = vmatprep.subr.bf16.mxu0 %v2858_v0  ;;  %v1336_v61 = vld [vmem:[#allocation10 + $0x178] sm:$0xff] }
 0x1d4   : > { %2559 = vmatprep.mubr.f32.mxu1 %v624_v4  ;;  %v1299_v4 = vld [vmem:[#allocation10 + $0x50] sm:$0xff]  ;;  %2829 = vmatpush1.bf16.msra.mxu1 %v2828_v2  ;;  %v2886_v63 = vpack.c.bf16 %v1336_v61, %v1333_v60  ;;  %v4687_v2 = vmov 0.0   ;;  %v3813_v60 = vld [vmem:[#allocation11 + $0xf8] sm:$0xff] }
 0x1d5   : > { %2560 = vmatmul.mubr.f32.gmra.mrb[14].mxu1 %v625_v5  ;;  %v2830_v5 = vpack.c.bf16 %v1299_v4, %v1296_v3  ;;  %v1644_v3 = vld [vmem:[#allocation11 + $0x8] sm:$0xff]  ;;  %v1647_v4 = vld [vmem:[#allocation11 + $0x20] sm:$0xff]  ;;  %4735 = vst [vmem:[#allocation21_spill] sm:$0xff] %v3813_v60 }
 0x1d6   : > { %1401 = vmatprep.mubr.f32.mxu1 %v4687_v2  ;;  %v1684_v2 = vld [vmem:[#allocation11 + $0x148] sm:$0xff] }
 0x1d7   : > { %2831 = vmatprep.subr.bf16.mxu1 %v2830_v5  ;;  %v2890_v5 = vpack.c.bf16 %v1647_v4, %v1644_v3  ;;  %v3824_v3 = vld [vmem:[#allocation11 + $0x108] sm:$0xff] }
 0x1d8   : > { %4737 = vst [vmem:[#allocation23_spill] sm:$0xff] %v3824_v3 }
 0x28c   : > { %v2540_v10 = vpop.f32.mrb[0].mxu1 }
 0x28d   : > { %v721_v11 = vadd.f32 %v2540_v10, %v2281_v9  ;;  %v715_v12 = vpop.f32.mrb[1].mxu1  ;;  %v1298_v10 = vld [vmem:[#allocation10 + $0x48] sm:$0xff] }
 0x28e   : > { %v716_v13 = vadd.f32 %v2281_v9, %v715_v12  ;;  %v1302_v12 = vld [vmem:[#allocation10 + $0x68] sm:$0xff] }
 0x28f   : > { %v795_v16 = vmax.f32 %v721_v11, 0.0  ;;  %v2832_v11 = vpack.c.bf16 %v1298_v10, %v1295_v8 }
 0x290   : > { %v794_v14 = vmax.f32 %v716_v13, 0.0  ;;  %v2543_v15 = vpop.f32.mrb[2].mxu1  ;;  %v1305_v13 = vld [vmem:[#allocation10 + $0x80] sm:$0xff] }
 0x291   : > { %v731_v17 = vadd.f32 %v2543_v15, %v2281_v9  ;;  %v725_v18 = vpop.f32.mrb[3].mxu1  ;;  %2833 = vmatpush1.bf16.msra.mxu1 %v2832_v11  ;;  %v1303_v15 = vld [vmem:[#allocation10 + $0x70] sm:$0xff]  ;;  %v3734_v11 = vld [vmem:[%s4677_s6] ss:$0 sm:$0xff] }
 0x292   : > { %v726_v19 = vadd.f32 %v2281_v9, %v725_v18  ;;  %2594 = vmatprep.mubr.f32.mxu0 %v794_v14  ;;  %v2834_v14 = vpack.c.bf16 %v1305_v13, %v1302_v12  ;;  %v3736_v13 = vld [vmem:[#allocation11] sm:$0xff] }
 0x293   : > { %2595 = vmatmul.mubr.f32.vlgmr.msra.gmra.mrb[16].mxu0 %v795_v16  ;;  %v797_v22 = vmax.f32 %v731_v17, 0.0  ;;  %v1306_v16 = vld [vmem:[#allocation10 + $0x88] sm:$0xff]  ;;  %v1301_v17 = vld [vmem:[#allocation10 + $0x60] sm:$0xff] }
 0x294   : > { %v796_v20 = vmax.f32 %v726_v19, 0.0  ;;  %v2546_v21 = vpop.f32.mrb[4].mxu1  ;;  %2861 = vmatpush3.bf16.msra.mxu0 %v2858_v0  ;;  %v2866_v18 = vpack.c.bf16 %v1306_v16, %v1303_v15  ;;  %v1304_v19 = vld [vmem:[#allocation10 + $0x78] sm:$0xff]  ;;  %2835 = vmatprep.subr.bf16.mxu1 %v2834_v14  ;;  %v1334_v0 = vld [vmem:[#allocation10 + $0x168] sm:$0xff] }
 0x295   : > { %v741_v23 = vadd.f32 %v2546_v21, %v2281_v9  ;;  %v735_v24 = vpop.f32.mrb[5].mxu1  ;;  %v1308_v21 = vld [vmem:[#allocation10 + $0x98] sm:$0xff]  ;;  %v2856_v1 = vpack.c.bf16 %v1334_v0, %v1331_v62  ;;  %v3820_v0 = vld [vmem:[#allocation11 + $0x110] sm:$0xff] }
 0x296   : > { %v736_v25 = vadd.f32 %v2281_v9, %v735_v24  ;;  %2597 = vmatprep.mubr.f32.mxu0 %v796_v20  ;;  %v2836_v20 = vpack.c.bf16 %v1304_v19, %v1301_v17  ;;  %v1309_v24 = vld [vmem:[#allocation10 + $0xa0] sm:$0xff]  ;;  %v3738_v14 = vld [vmem:[#allocation11 + $0x18] sm:$0xff]  ;;  %v3748_v19 = vld [vmem:[#allocation11 + $0x30] sm:$0xff] }
 0x297   : > { %2598 = vmatmul.mubr.f32.gmra.mrb[18].mxu0 %v797_v22  ;;  %v799_v28 = vmax.f32 %v741_v23, 0.0  ;;  %v1311_v22 = vld [vmem:[#allocation10 + $0xb0] sm:$0xff]  ;;  %v3744_v17 = vld [vmem:[#allocation11 + $0x38] sm:$0xff] }
 0x298   : > { %v798_v26 = vmax.f32 %v736_v25, 0.0  ;;  %v2549_v27 = vpop.f32.mrb[6].mxu1  ;;  %2837 = vmatpush1.bf16.msra.mxu1 %v2836_v20  ;;  %v2838_v23 = vpack.c.bf16 %v1311_v22, %v1308_v21  ;;  %v1312_v25 = vld [vmem:[#allocation10 + $0xb8] sm:$0xff]  ;;  %v3753_v21 = vld [vmem:[#allocation11 + $0x48] sm:$0xff] }
 0x299   : > { %v751_v29 = vadd.f32 %v2549_v27, %v2281_v9  ;;  %v745_v30 = vpop.f32.mrb[7].mxu1  ;;  %v2870_v27 = vpack.c.bf16 %v1312_v25, %v1309_v24  ;;  %v3755_v22 = vld [vmem:[#allocation11 + $0x68] sm:$0xff]  ;;  %v3760_v25 = vld [vmem:[#allocation11 + $0x60] sm:$0xff] }
 0x29a   : > { %v746_v31 = vadd.f32 %v2281_v9, %v745_v30  ;;  %2600 = vmatprep.mubr.f32.mxu0 %v798_v26  ;;  %v1307_v26 = vld [vmem:[#allocation10 + $0x90] sm:$0xff]  ;;  %2839 = vmatprep.subr.bf16.mxu1 %v2838_v23  ;;  %v1314_v30 = vld [vmem:[#allocation10 + $0xc8] sm:$0xff]  ;;  %v3757_v23 = vld [vmem:[#allocation11 + $0x80] sm:$0xff] }
 0x29b   : > { %2601 = vmatmul.mubr.f32.gmra.mrb[20].mxu0 %v799_v28  ;;  %v801_v34 = vmax.f32 %v751_v29, 0.0  ;;  %v1310_v28 = vld [vmem:[#allocation10 + $0xa8] sm:$0xff] }
 0x29c   : > { %v800_v32 = vmax.f32 %v746_v31, 0.0  ;;  %v2552_v33 = vpop.f32.mrb[8].mxu1  ;;  %v2840_v29 = vpack.c.bf16 %v1310_v28, %v1307_v26  ;;  %v1317_v31 = vld [vmem:[#allocation10 + $0xe0] sm:$0xff]  ;;  %v3762_v26 = vld [vmem:[#allocation11 + $0x78] sm:$0xff] }
 0x29d   : > { %v761_v35 = vadd.f32 %v2552_v33, %v2281_v9  ;;  %v755_v36 = vpop.f32.mrb[9].mxu1  ;;  %v1315_v33 = vld [vmem:[#allocation10 + $0xd0] sm:$0xff] }
 0x29e   : > { %v756_v37 = vadd.f32 %v2281_v9, %v755_v36  ;;  %2603 = vmatprep.mubr.f32.mxu0 %v800_v32  ;;  %2841 = vmatpush1.bf16.msra.mxu1 %v2840_v29  ;;  %v2842_v32 = vpack.c.bf16 %v1317_v31, %v1314_v30  ;;  %v1654_v31 = vld [vmem:[#allocation11 + $0x58] sm:$0xff] }
 0x29f   : > { %2604 = vmatmul.mubr.f32.gmra.mrb[22].mxu0 %v801_v34  ;;  %v803_v40 = vmax.f32 %v761_v35, 0.0  ;;  %v1318_v34 = vld [vmem:[#allocation10 + $0xe8] sm:$0xff]  ;;  %v1313_v35 = vld [vmem:[#allocation10 + $0xc0] sm:$0xff] }
 0x2a0   : > { %v802_v38 = vmax.f32 %v756_v37, 0.0  ;;  %v2555_v39 = vpop.f32.mrb[10].mxu1  ;;  %v2874_v36 = vpack.c.bf16 %v1318_v34, %v1315_v33  ;;  %v1316_v37 = vld [vmem:[#allocation10 + $0xd8] sm:$0xff]  ;;  %2843 = vmatprep.subr.bf16.mxu1 %v2842_v32 }
 0x2a1   : > { %v771_v41 = vadd.f32 %v2555_v39, %v2281_v9  ;;  %v765_v42 = vpop.f32.mrb[11].mxu1  ;;  %v1320_v39 = vld [vmem:[#allocation10 + $0xf8] sm:$0xff] }
 0x2a2   : > { %v766_v43 = vadd.f32 %v2281_v9, %v765_v42  ;;  %2606 = vmatprep.mubr.f32.mxu0 %v802_v38  ;;  %v2844_v38 = vpack.c.bf16 %v1316_v37, %v1313_v35  ;;  %v1321_v42 = vld [vmem:[#allocation10 + $0x100] sm:$0xff]  ;;  %v3770_v32 = vld [vmem:[#allocation11 + $0x98] sm:$0xff] }
 0x2a3   : > { %2607 = vmatmul.mubr.f32.gmra.mrb[24].mxu0 %v803_v40  ;;  %v805_v46 = vmax.f32 %v771_v41, 0.0  ;;  %v1323_v40 = vld [vmem:[#allocation10 + $0x110] sm:$0xff] }
 0x2a4   : > { %v804_v44 = vmax.f32 %v766_v43, 0.0  ;;  %v2558_v45 = vpop.f32.mrb[12].mxu1  ;;  %2845 = vmatpush1.bf16.msra.mxu1 %v2844_v38  ;;  %v2846_v41 = vpack.c.bf16 %v1323_v40, %v1320_v39  ;;  %v1324_v43 = vld [vmem:[#allocation10 + $0x118] sm:$0xff]  ;;  %v3782_v38 = vld [vmem:[#allocation11 + $0xb0] sm:$0xff]  ;;  %v3786_v40 = vld [vmem:[#allocation11 + $0xa8] sm:$0xff] }
 0x2a5   : > { %v781_v47 = vadd.f32 %v2558_v45, %v2281_v9  ;;  %v775_v48 = vpop.f32.mrb[13].mxu1  ;;  %v2878_v45 = vpack.c.bf16 %v1324_v43, %v1321_v42  ;;  %v3784_v39 = vld [vmem:[#allocation11 + $0x90] sm:$0xff] }
 0x2a6   : > { %v776_v49 = vadd.f32 %v2281_v9, %v775_v48  ;;  %2609 = vmatprep.mubr.f32.mxu0 %v804_v44  ;;  %v1319_v44 = vld [vmem:[#allocation10 + $0xf0] sm:$0xff]  ;;  %2847 = vmatprep.subr.bf16.mxu1 %v2846_v41  ;;  %v1326_v48 = vld [vmem:[#allocation10 + $0x128] sm:$0xff] }
 0x2a7   : > { %2610 = vmatmul.mubr.f32.gmra.mrb[26].mxu0 %v805_v46  ;;  %v807_v52 = vmax.f32 %v781_v47, 0.0  ;;  %v1322_v46 = vld [vmem:[#allocation10 + $0x108] sm:$0xff] }
 0x2a8   : > { %v806_v50 = vmax.f32 %v776_v49, 0.0  ;;  %v2561_v51 = vpop.f32.mrb[14].mxu1  ;;  %v2848_v47 = vpack.c.bf16 %v1322_v46, %v1319_v44  ;;  %v1329_v49 = vld [vmem:[#allocation10 + $0x140] sm:$0xff]  ;;  %v1678_v44 = vld [vmem:[#allocation11 + $0x118] sm:$0xff] }
 0x2a9   : > { %v791_v53 = vadd.f32 %v2561_v51, %v2281_v9  ;;  %v785_v54 = vpop.f32.mrb[15].mxu1  ;;  %v1327_v51 = vld [vmem:[#allocation10 + $0x130] sm:$0xff]  ;;  %v3797_v46 = vld [vmem:[#allocation11 + $0xe0] sm:$0xff] }
 0x2aa   : > { %v786_v55 = vadd.f32 %v2281_v9, %v785_v54  ;;  %2612 = vmatprep.mubr.f32.mxu0 %v806_v50  ;;  %v2862_v9 = vpack.c.bf16 %v1300_v7, %v1297_v6  ;;  %2849 = vmatpush1.bf16.msra.mxu1 %v2848_v47  ;;  %v2850_v50 = vpack.c.bf16 %v1329_v49, %v1326_v48  ;;  %v1645_v6 = vld [vmem:[#allocation11 + $0x10] sm:$0xff]  ;;  %v1648_v7 = vld [vmem:[#allocation11 + $0x28] sm:$0xff]  ;;  %v3799_v47 = vld [vmem:[#allocation11 + $0xc0] sm:$0xff] }
 0x2ab   : > { %2613 = vmatmul.mubr.f32.gmra.mrb[28].mxu0 %v807_v52  ;;  %v809_v57 = vmax.f32 %v791_v53, 0.0  ;;  %v1330_v52 = vld [vmem:[#allocation10 + $0x148] sm:$0xff]  ;;  %v1325_v53 = vld [vmem:[#allocation10 + $0x120] sm:$0xff]  ;;  %v3726_v8 = vpack.c.bf16 %v1648_v7, %v1645_v6  ;;  %v3801_v48 = vld [vmem:[#allocation11 + $0xd8] sm:$0xff] }
 0x2ac   : > { %v808_v56 = vmax.f32 %v786_v55, 0.0  ;;  %2863 = vmatprep.subr.bf16.mxu0 %v2862_v9  ;;  %v2882_v54 = vpack.c.bf16 %v1330_v52, %v1327_v51  ;;  %v1328_v55 = vld [vmem:[#allocation10 + $0x138] sm:$0xff]  ;;  %2851 = vmatprep.subr.bf16.mxu1 %v2850_v50  ;;  %v3834_v7 = vld [vmem:[#allocation11 + $0x128] sm:$0xff]  ;;  %v1675_v51 = vld [vmem:[#allocation11 + $0x100] sm:$0xff] }
 0x2ad   : > { %2865 = vmatpush3.bf16.msra.mxu0 %v2862_v9  ;;  %v978_v9 = vlaneseq  ;;  %4739 = vst [vmem:[#allocation25_spill] sm:$0xff] %v3834_v7  ;;  %v3868_v52 = vld [vmem:[#allocation11 + $0x168] sm:$0xff] }
 0x2ae   : > { %2615 = vmatprep.mubr.f32.mxu0 %v808_v56  ;;  %2867 = vmatprep.subr.bf16.mxu0 %v2866_v18  ;;  %v2852_v56 = vpack.c.bf16 %v1328_v55, %v1325_v53  ;;  %v1657_v53 = vld [vmem:[#allocation11 + $0x70] sm:$0xff]  ;;  %4747 = vst [vmem:[#allocation33_spill] sm:$0xff] %v3868_v52 }
 0x2af   : > { %2616 = vmatmul.mubr.f32.gmra.mrb[30].mxu0 %v809_v57  ;;  %v1332_v57 = vld [vmem:[#allocation10 + $0x158] sm:$0xff]  ;;  %v3729_v10 = vand.u32 127, %v978_v9  ;;  %v3836_v9 = vld [vmem:[#allocation11 + $0x140] sm:$0xff] }
 0x2b0   : > { %2853 = vmatpush1.bf16.msra.mxu1 %v2852_v56  ;;  %v2854_v59 = vpack.c.bf16 %v1335_v58, %v1332_v57  ;;  %4740 = vst [vmem:[#allocation26_spill] sm:$0xff] %v3836_v9 }
 0x2b1   : > { %2869 = vmatpush3.bf16.msra.mxu0 %v2866_v18  ;;  %vm2077_vm0 = vcmp.lt.s32.totalorder %v3729_v10, 3  ;;  %v3746_v18 = vld [vmem:[#allocation11 + $0x50] sm:$0xff]  ;;  %vm980_vm1 = vcmp.eq.s32.totalorder %v3729_v10, 3  ;;  %vm981_vm2 = vcmp.eq.s32.totalorder %v3729_v10, 5  ;;  %vm982_vm3 = vcmp.eq.s32.totalorder %v3729_v10, 8 }
 0x2b2   : > { %2871 = vmatprep.subr.bf16.mxu0 %v2870_v27  ;;  %2855 = vmatprep.subr.bf16.mxu1 %v2854_v59  ;;  %vm983_vm7 = vmor %vm980_vm1, %vm981_vm2 }
 0x2b3   : > { %vm3996_vm9 = vmor %vm983_vm7, %vm982_vm3 }
 0x2b4   : > { %2857 = vmatpush1.bf16.msra.mxu1 %v2856_v1  ;;  %v3822_v1 = vld [vmem:[#allocation11 + $0xf0] sm:$0xff] }
 0x2b5   : > { %2873 = vmatpush3.bf16.msra.mxu0 %v2870_v27  ;;  %2923 = vmatprep.subr.bf16.mxu1 %v3726_v8  ;;  %v1651_v27 = vld [vmem:[#allocation11 + $0x40] sm:$0xff]  ;;  %4736 = vst [vmem:[#allocation22_spill] sm:$0xff] %v3822_v1  ;;  %v1690_v1 = vld [vmem:[#allocation11 + $0x178] sm:$0xff] }
 0x2b6   : > { %2875 = vmatprep.subr.bf16.mxu0 %v2874_v36  ;;  %v3809_v58 = vpack.c.bf16 %v1654_v31, %v1651_v27 }
 0x2b9   : > { %2877 = vmatpush3.bf16.msra.mxu0 %v2874_v36 }
 0x2ba   : > { %2879 = vmatprep.subr.bf16.mxu0 %v2878_v45 }
 0x2bd   : > { %2881 = vmatpush3.bf16.msra.mxu0 %v2878_v45  ;;  %v3795_v45 = vld [vmem:[#allocation11 + $0xc8] sm:$0xff] }
 0x2be   : > { %2883 = vmatprep.subr.bf16.mxu0 %v2882_v54 }
 0x2c1   : > { %2885 = vmatpush3.bf16.msra.mxu0 %v2882_v54  ;;  %v1660_v54 = vld [vmem:[#allocation11 + $0x88] sm:$0xff] }
 0x2c2   : > { %2887 = vmatprep.subr.bf16.mxu0 %v2886_v63 }
 0x2c5   : > { %2889 = vmatpush3.bf16.msra.mxu0 %v2886_v63 }
 0x2c6   : > { %2891 = vmatprep.subr.bf16.mxu0 %v2890_v5 }
 0x366   : > { %v2596_v12 = vpop.f32.mrb[16].mxu0 }
 0x367   : > { %v3742_v15 = vadd.f32 %v2596_v12, %v3734_v11  ;;  %v899_v16 = vpop.f32.mrb[17].mxu0  ;;  %v3838_v12 = vld [vmem:[#allocation11 + $0x120] sm:$0xff] }
 0x368   : > { %v3751_v20 = vadd.f32 %v3734_v11, %v899_v16  ;;  %4741 = vst [vmem:[#allocation27_spill] sm:$0xff] %v3838_v12  ;;  %v3840_v16 = vld [vmem:[#allocation11 + $0x138] sm:$0xff] }
 0x369   : > { %v1034_v24 = vand.u32 2147483647, %v3742_v15  ;;  %v3767_v28 = vsel %vm2077_vm0, %v3742_v15, 0.0  ;;  %4742 = vst [vmem:[#allocation28_spill] sm:$0xff] %v3840_v16  ;;  %vm1002_vm5 = vcmp.ne.f32.partialorder %v3742_v15, %v3742_v15 }
 0x36a   : > { %4733 = vst [vmem:[#allocation19_spill] sm:$0xff] %v3767_v28  ;;  %v1033_v29 = vand.u32 2147483647, %v3751_v20  ;;  %v2599_v30 = vpop.f32.mrb[18].mxu0  ;;  %v3775_v33 = vsel %vm2077_vm0, %v3751_v20, 0.0  ;;  %vm1001_vm4 = vcmp.ne.f32.partialorder %v3751_v20, %v3751_v20 }
 0x36b   : > { %4734 = vst [vmem:[#allocation20_spill] sm:$0xff] %v3775_v33  ;;  %v1050_v34 = vsub.f32 0.0, %v1034_v24  ;;  %v3778_v35 = vadd.f32 %v2599_v30, %v3734_v11  ;;  %v909_v36 = vpop.f32.mrb[19].mxu0  ;;  %v1663_v24 = vld [vmem:[#allocation11 + $0xa0] sm:$0xff] }
 0x36c   : > { %v1049_v41 = vsub.f32 0.0, %v1033_v29  ;;  %v3789_v42 = vadd.f32 %v3734_v11, %v909_v36  ;;  %v1666_v36 = vld [vmem:[#allocation11 + $0xb8] sm:$0xff] }
 0x36d   : > { %v1067_v49 = vmul.f32 1.442695, %v1050_v34  ;;  %v1036_v50 = vand.u32 2147483647, %v3778_v35  ;;  %v3829_v4 = vsel %vm2077_vm0, %v3778_v35, 0.0  ;;  %v3852_v34 = vpack.c.bf16 %v1660_v54, %v1657_v53  ;;  %v3866_v54 = vld [vmem:[#allocation11 + $0x150] sm:$0xff] }
 0x36e   : > { %v1065_v55 = vmul.f32 1.442695, %v1049_v41  ;;  %v1035_v56 = vand.u32 2147483647, %v3789_v42  ;;  %v2602_v57 = vpop.f32.mrb[20].mxu0  ;;  %4738 = vst [vmem:[#allocation24_spill] sm:$0xff] %v3829_v4  ;;  %vm1003_vm10 = vcmp.ne.f32.partialorder %v3789_v42, %v3789_v42  ;;  %vm1004_vm12 = vcmp.ne.f32.partialorder %v3778_v35, %v3778_v35 }
 0x36f   : > { %3058 = vpow2.f32 %v1067_v49  ;;  %v3816_v61 = vadd.f32 %v2602_v57, %v3734_v11  ;;  %v919_v62 = vpop.f32.mrb[21].mxu0  ;;  %v3845_v27 = vsel %vm2077_vm0, %v3789_v42, 0.0  ;;  %v3854_v41 = vld [vmem:[#allocation11 + $0x158] sm:$0xff]  ;;  %v3856_v49 = vld [vmem:[#allocation11 + $0x170] sm:$0xff]  ;;  %4746 = vst [vmem:[#allocation32_spill] sm:$0xff] %v3866_v54 }
 0x370   : > { %3060 = vpow2.f32 %v1065_v55  ;;  %v1051_v5 = vsub.f32 0.0, %v1035_v56  ;;  %v3832_v6 = vadd.f32 %v3734_v11, %v919_v62  ;;  %4743 = vst [vmem:[#allocation29_spill] sm:$0xff] %v3845_v27  ;;  %4744 = vst [vmem:[#allocation30_spill] sm:$0xff] %v3854_v41  ;;  %v1052_v55 = vsub.f32 0.0, %v1036_v50  ;;  %v1669_v50 = vld [vmem:[#allocation11 + $0xd0] sm:$0xff] }
 0x371   : > { %v1038_v29 = vand.u32 2147483647, %v3816_v61  ;;  %4745 = vst [vmem:[#allocation31_spill] sm:$0xff] %v3856_v49  ;;  %vm1006_vm1 = vcmp.ne.f32.partialorder %v3816_v61, %v3816_v61 }
 0x372   : > { %v1069_v56 = vmul.f32 1.442695, %v1051_v5  ;;  %v1037_v57 = vand.u32 2147483647, %v3832_v6  ;;  %v2605_v62 = vpop.f32.mrb[22].mxu0  ;;  %v3873_v5 = vsel %vm2077_vm0, %v3816_v61, 0.0  ;;  %vm1005_vm14 = vcmp.ne.f32.partialorder %v3832_v6, %v3832_v6 }
 0x373   : > { %v1054_v59 = vsub.f32 0.0, %v1038_v29  ;;  %v3862_v30 = vadd.f32 %v2605_v62, %v3734_v11  ;;  %v929_v31 = vpop.f32.mrb[23].mxu0  ;;  %4748 = vst [vmem:[#allocation34_spill] sm:$0xff] %v3873_v5  ;;  %v1672_v62 = vld [vmem:[#allocation11 + $0xe8] sm:$0xff]  ;;  %v3881_v53 = vsel %vm2077_vm0, %v3832_v6, 0.0  ;;  %v1687_v5 = vld [vmem:[#allocation11 + $0x160] sm:$0xff] }
 0x374   : > { %3062 = vpow2.f32 %v1069_v56  ;;  %v1053_v63 = vsub.f32 0.0, %v1037_v57  ;;  %v3876_v29 = vadd.f32 %v3734_v11, %v929_v31  ;;  %4749 = vst [vmem:[#allocation35_spill] sm:$0xff] %v3881_v53  ;;  %v3888_v57 = vpack.c.bf16 %v1666_v36, %v1663_v24  ;;  %v1681_v31 = vld [vmem:[#allocation11 + $0x130] sm:$0xff] }
 0x375   : > { %v1040_v43 = vand.u32 2147483647, %v3862_v30  ;;  %v1071_v4 = vmul.f32 1.442695, %v1052_v55  ;;  %v1075_v37 = vmul.f32 1.442695, %v1054_v59  ;;  %v3898_v36 = vpack.c.bf16 %v1672_v62, %v1669_v50 }
 0x376   : > { %v1039_v27 = vand.u32 2147483647, %v3876_v29  ;;  %v2608_v33 = vpop.f32.mrb[24].mxu0  ;;  %v3903_v55 = vsel %vm2077_vm0, %v3862_v30, 0.0  ;;  %v1073_v56 = vmul.f32 1.442695, %v1053_v63  ;;  %v3916_v62 = vpack.c.bf16 %v1678_v44, %v1675_v51 }
 0x377   : > { %v3896_v7 = vadd.f32 %v2608_v33, %v3734_v11  ;;  %v939_v24 = vpop.f32.mrb[25].mxu0  ;;  %4750 = vst [vmem:[#allocation36_spill] sm:$0xff] %v3903_v55  ;;  %v1056_v12 = vsub.f32 0.0, %v1040_v43  ;;  %v3911_v59 = vsel %vm2077_vm0, %v3876_v29, 0.0  ;;  %v3918_v28 = vpack.c.bf16 %v1684_v2, %v1681_v31 }
 0x378   : > { %v3906_v53 = vadd.f32 %v3734_v11, %v939_v24  ;;  %4751 = vst [vmem:[#allocation37_spill] sm:$0xff] %v3911_v59  ;;  %4752 = vst [vmem:[#allocation38_spill] sm:$0xff] %v3916_v62  ;;  %v3920_v54 = vpack.c.bf16 %v1690_v1, %v1687_v5  ;;  %3064 = vpow2.f32 %v1071_v4  ;;  %v1055_v43 = vsub.f32 0.0, %v1039_v27 }
 0x379   : > { %v3913_v33 = vpop.eup %3058  ;;  %v1042_v50 = vand.u32 2147483647, %v3896_v7  ;;  %4753 = vst [vmem:[#allocation39_spill] sm:$0xff] %v3918_v28  ;;  %3066 = vpow2.f32 %v1075_v37  ;;  %v1079_v51 = vmul.f32 1.442695, %v1056_v12  ;;  %vm1007_vm3 = vcmp.ne.f32.partialorder %v3876_v29, %v3876_v29 }
 0x37a   : > { %4754 = vst [vmem:[#allocation40_spill] sm:$0xff] %v3920_v54  ;;  %v3922_v63 = vpop.eup %3060  ;;  %v2611_v24 = vpop.f32.mrb[26].mxu0  ;;  %v1106_v52 = vadd.f32 1.0, %v3913_v33  ;;  %v1041_v59 = vand.u32 2147483647, %v3906_v53  ;;  %3068 = vpow2.f32 %v1073_v56  ;;  %vm1010_vm7 = vcmp.ne.f32.partialorder %v3896_v7, %v3896_v7 }
 0x37b   : > { %v3928_v41 = vadd.f32 %v2611_v24, %v3734_v11  ;;  %v949_v44 = vpop.f32.mrb[27].mxu0  ;;  %v1097_v2 = vadd.f32 1.0, %v3922_v63  ;;  %v1058_v27 = vsub.f32 0.0, %v1042_v50  ;;  %v1077_v24 = vmul.f32 1.442695, %v1055_v43 }
 0x37c   : > { %v3932_v1 = vadd.f32 %v3734_v11, %v949_v44  ;;  %v1057_v55 = vsub.f32 0.0, %v1041_v59  ;;  %v1109_v44 = vmul.f32 -0.5, %v3913_v33 }
 0x37d   : > { %4755 = vst [vmem:[#allocation41_spill] sm:$0xff] %v3928_v41  ;;  %v1044_v5 = vand.u32 2147483647, %v3928_v41  ;;  %3070 = vlog2.f32 %v1097_v2  ;;  %v1100_v2 = vmul.f32 -0.5, %v3922_v63  ;;  %v1083_v43 = vmul.f32 1.442695, %v1058_v27 }
 0x37e   : > { %4756 = vst [vmem:[#allocation42_spill] sm:$0xff] %v3932_v1  ;;  %v3939_v31 = vpop.eup %3062  ;;  %v2614_v56 = vpop.f32.mrb[28].mxu0  ;;  %3072 = vlog2.f32 %v1106_v52  ;;  %v1043_v50 = vand.u32 2147483647, %v3932_v1 }
 0x37f   : > { %v3945_v4 = vadd.f32 %v2614_v56, %v3734_v11  ;;  %v959_v54 = vpop.f32.mrb[29].mxu0  ;;  %3074 = vpow2.f32 %v1079_v51  ;;  %v1060_v37 = vsub.f32 0.0, %v1044_v5  ;;  %v1115_v56 = vadd.f32 1.0, %v3939_v31 }
 0x380   : > { %v3949_v41 = vadd.f32 %v3734_v11, %v959_v54  ;;  %3076 = vpow2.f32 %v1077_v24  ;;  %v1103_v51 = vand.u32 2147483647, %v3922_v63  ;;  %v1081_v5 = vmul.f32 1.442695, %v1057_v55 }
 0x381   : > { %4757 = vst [vmem:[#allocation43_spill] sm:$0xff] %v3945_v4  ;;  %v1046_v59 = vand.u32 2147483647, %v3945_v4  ;;  %v1059_v16 = vsub.f32 0.0, %v1043_v50  ;;  %v1101_v52 = vadd.f32 1.0, %v1100_v2  ;;  %v1110_v50 = vadd.f32 1.0, %v1109_v44 }
 0x382   : > { %4758 = vst [vmem:[#allocation44_spill] sm:$0xff] %v3949_v41  ;;  %v1045_v12 = vand.u32 2147483647, %v3949_v41  ;;  %v2617_v49 = vpop.f32.mrb[30].mxu0  ;;  %v3962_v4 = vpop.eup %3064  ;;  %v1087_v28 = vmul.f32 1.442695, %v1060_v37  ;;  %3078 = vlog2.f32 %v1115_v56 }
 0x383   : > { %v3960_v1 = vadd.f32 %v2617_v49, %v3734_v11  ;;  %v969_v27 = vpop.f32.mrb[31].mxu0  ;;  %v1062_v9 = vsub.f32 0.0, %v1046_v59  ;;  %v1118_v41 = vmul.f32 -0.5, %v3939_v31  ;;  %v3970_v54 = vpop.eup %3066  ;;  %3080 = vpow2.f32 %v1083_v43 }
 0x384   : > { %v3965_v24 = vadd.f32 %v3734_v11, %v969_v27  ;;  %v1061_v55 = vsub.f32 0.0, %v1045_v12  ;;  %v3975_v37 = vpop.eup %3068  ;;  %vm3978_vm6 = vcmp.lt.f32.partialorder %v1103_v51, 0.0004427343  ;;  %v1112_v59 = vand.u32 2147483647, %v3913_v33 }
 0x385   : > { %4759 = vst [vmem:[#allocation45_spill] sm:$0xff] %v3960_v1  ;;  %v1048_v49 = vand.u32 2147483647, %v3960_v1  ;;  %3082 = vpow2.f32 %v1081_v5  ;;  %v1085_v12 = vmul.f32 1.442695, %v1059_v16  ;;  %v1102_v3 = vmul.f32 %v3922_v63, %v1101_v52 }
 0x386   : > { %4760 = vst [vmem:[#allocation46_spill] sm:$0xff] %v3965_v24  ;;  %v1047_v11 = vand.u32 2147483647, %v3965_v24  ;;  %3084 = vpow2.f32 %v1087_v28  ;;  %v1091_v44 = vmul.f32 1.442695, %v1062_v9  ;;  %v1124_v56 = vadd.f32 1.0, %v3962_v4 }
 0x387   : > { %v3071_v27 = vpop.eup %3070  ;;  %v1064_v1 = vsub.f32 0.0, %v1048_v49  ;;  %v1089_v51 = vmul.f32 1.442695, %v1061_v55  ;;  %v1111_v60 = vmul.f32 %v3913_v33, %v1110_v50  ;;  %v1119_v5 = vadd.f32 1.0, %v1118_v41 }
 0x388   : > { %v3073_v62 = vpop.eup %3072  ;;  %v1099_v43 = vmul.f32 0.6931472, %v3071_v27  ;;  %v1063_v49 = vsub.f32 0.0, %v1047_v11  ;;  %vm1113_vm8 = vcmp.lt.f32.partialorder %v1112_v59, 0.0004427343  ;;  %3086 = vlog2.f32 %v1124_v56 }
 0x389   : > { %v1108_v24 = vmul.f32 0.6931472, %v3073_v62  ;;  %v3990_v16 = vpop.eup %3074  ;;  %3088 = vpow2.f32 %v1085_v12  ;;  %v1095_v9 = vmul.f32 1.442695, %v1064_v1  ;;  %v4765_v62 = vmax.f32 %v3751_v20, 0.0 }
 0x38a   : > { %v1105_v28 = vsel %vm3978_vm6, %v1102_v3, %v1099_v43  ;;  %v4002_v52 = vpop.eup %3076  ;;  %3090 = vpow2.f32 %v1091_v44  ;;  %v4766_v55 = vmax.f32 %v3742_v15, 0.0  ;;  %v1127_v1 = vmul.f32 -0.5, %v3962_v4 }
 0x38b   : > { %v1241_v33 = vadd.f32 %v1105_v28, %v4765_v62  ;;  %v1114_v41 = vsel %vm1113_vm8, %v1111_v60, %v1108_v24  ;;  %v1133_v50 = vadd.f32 1.0, %v3975_v37  ;;  %3092 = vpow2.f32 %v1089_v51 }
 0x38c   : > { %v1242_v3 = vadd.f32 %v1114_v41, %v4766_v55  ;;  %v1120_v60 = vmul.f32 %v3939_v31, %v1119_v5  ;;  %v1121_v24 = vand.u32 2147483647, %v3939_v31  ;;  %v1093_v2 = vmul.f32 1.442695, %v1063_v49  ;;  %v3079_v12 = vpop.eup %3078 }
 0x38d   : > { %v1257_v11 = vsel %vm1001_vm4, %v3751_v20, %v1241_v33  ;;  %3094 = vlog2.f32 %v1133_v50  ;;  %v1142_v44 = vadd.f32 1.0, %v3970_v54  ;;  %v4034_v43 = vpop.eup %3080  ;;  %v4767_v56 = vmov 0.0  }
 0x38e   : > { %v4019_v59 = vsel %vm3996_vm9, %v1257_v11, %v3751_v20  ;;  %v1258_v27 = vsel %vm1002_vm5, %v3742_v15, %v1242_v3  ;;  %3096 = vpow2.f32 %v1095_v9  ;;  %v1136_v20 = vmul.f32 -0.5, %v3975_v37 }
 0x38f   : > { %1402 = vmatmul.mubr.f32.vlgmr.msra.gmra.mrb[16].mxu1 %v4019_v59  ;;  %2650 = vmatprep.mubr.f32.mxu0 %v4019_v59  ;;  %v4030_v31 = vsel %vm3996_vm9, %v1258_v27, %v3742_v15  ;;  %v1117_v51 = vmul.f32 0.6931472, %v3079_v12  ;;  %v1128_v5 = vadd.f32 1.0, %v1127_v1  ;;  %v1130_v49 = vand.u32 2147483647, %v3962_v4  ;;  %v4040_v9 = vpop.eup %3082 }
 0x390   : > { %2651 = vmatmul.mubr.f32.vlgmr.msra.gmra.mrb[32].mxu0 %v4030_v31  ;;  %1407 = vmatprep.mubr.f32.mxu1 %v4767_v56  ;;  %v1151_v28 = vadd.f32 1.0, %v4002_v52  ;;  %v4768_v15 = vpack.c.bf16 %v3738_v14, %v3736_v13  ;;  %vm1122_vm11 = vcmp.lt.f32.partialorder %v1121_v24, 0.0004427343  ;;  %3098 = vlog2.f32 %v1142_v44  ;;  %v4050_v41 = vpop.eup %3084 }
 0x391   : > { %2925 = vmatpush3.bf16.msra.mxu1 %v3726_v8  ;;  %v991_v62 = vmax.f32 %v3876_v29, 0.0  ;;  %v994_v33 = vmax.f32 %v3896_v7, 0.0  ;;  %v1123_v55 = vsel %vm1122_vm11, %v1120_v60, %v1117_v51  ;;  %v4769_v3 = vpack.c.bf16 %v3746_v18, %v3744_v17 }
 0x392   : > { %2893 = vmatpush1.bf16.msra.mxu0 %v4768_v15  ;;  %v1139_v13 = vand.u32 2147483647, %v3975_v37  ;;  %v1145_v8 = vmul.f32 -0.5, %v3970_v54  ;;  %2927 = vmatprep.subr.bf16.mxu1 %v3809_v58  ;;  %3100 = vlog2.f32 %v1151_v28  ;;  %v4770_v14 = vmax.f32 %v3789_v42, 0.0  ;;  %v3087_v60 = vpop.eup %3086 }
 0x393   : > { %2895 = vmatprep.subr.bf16.mxu0 %v4769_v3  ;;  %3102 = vpow2.f32 %v1093_v2  ;;  %1408 = vmatmul.mubr.f32.gmra.mrb[18].mxu1 %v4030_v31  ;;  %v1137_v50 = vadd.f32 1.0, %v1136_v20  ;;  %v1160_v11 = vadd.f32 1.0, %v3990_v16  ;;  %v1129_v17 = vmul.f32 %v3962_v4, %v1128_v5  ;;  %v4070_v27 = vpop.eup %3088 }
 0x394   : > { %v1243_v1 = vadd.f32 %v1123_v55, %v4770_v14  ;;  %vm4063_vm13 = vcmp.lt.f32.partialorder %v1130_v49, 0.0004427343  ;;  %1413 = vmatprep.mubr.f32.mxu1 %v4767_v56  ;;  %v1148_v24 = vand.u32 2147483647, %v3970_v54  ;;  %v1154_v2 = vmul.f32 -0.5, %v4002_v52  ;;  %v4083_v51 = vpop.eup %3090 }
 0x395   : > { %v1126_v20 = vmul.f32 0.6931472, %v3087_v60  ;;  %v4773_v4 = vpack.c.bf16 %v3753_v21, %v3748_v19  ;;  %2929 = vmatpush3.bf16.msra.mxu1 %v3809_v58  ;;  %v1157_v44 = vand.u32 2147483647, %v4002_v52  ;;  %3104 = vlog2.f32 %v1160_v11  ;;  %v4099_v28 = vpop.eup %3092 }
 0x396   : > { %v1259_v12 = vsel %vm1003_vm10, %v3789_v42, %v1243_v1  ;;  %vm4090_vm15 = vcmp.lt.f32.partialorder %v1139_v13, 0.0004427343  ;;  %v4776_v19 = vpack.c.bf16 %v3757_v23, %v3755_v22  ;;  %v1146_v21 = vadd.f32 1.0, %v1145_v8  ;;  %2931 = vmatprep.subr.bf16.mxu1 %v3852_v34 }
 0x397   : > { %2897 = vmatpush1.bf16.msra.mxu0 %v4773_v4  ;;  %v4088_v5 = vsel %vm3996_vm9, %v1259_v12, %v3789_v42  ;;  %v1169_v58 = vadd.f32 1.0, %v4040_v9  ;;  %v1132_v42 = vsel %vm4063_vm13, %v1129_v17, %v1126_v20  ;;  %v1138_v15 = vmul.f32 %v3975_v37, %v1137_v50  ;;  %v3095_v23 = vpop.eup %3094 }
 0x398   : > { %2899 = vmatprep.subr.bf16.mxu0 %v4776_v19  ;;  %2653 = vmatprep.mubr.f32.mxu0 %v4088_v5  ;;  %v1163_v55 = vmul.f32 -0.5, %v3990_v16  ;;  %v1178_v22 = vadd.f32 1.0, %v4034_v43  ;;  %v4777_v3 = vmax.f32 %v3778_v35, 0.0  ;;  %vm4112_vm2 = vcmp.lt.f32.partialorder %v1148_v24, 0.0004427343  ;;  %v4117_v37 = vpop.eup %3096 }
 0x399   : > { %1414 = vmatmul.mubr.f32.gmra.mrb[20].mxu1 %v4088_v5  ;;  %v1155_v14 = vadd.f32 1.0, %v1154_v2  ;;  %3106 = vlog2.f32 %v1169_v58  ;;  %v1135_v1 = vmul.f32 0.6931472, %v3095_v23  ;;  %v4780_v50 = vpack.c.bf16 %v3762_v26, %v3760_v25 }
 0x39a   : > { %v1244_v13 = vadd.f32 %v1132_v42, %v4777_v3  ;;  %1419 = vmatprep.mubr.f32.mxu1 %v4767_v56  ;;  %vm4124_vm4 = vcmp.lt.f32.partialorder %v1157_v44, 0.0004427343  ;;  %v1172_v60 = vmul.f32 -0.5, %v4040_v9  ;;  %3108 = vlog2.f32 %v1178_v22  ;;  %2933 = vmatpush3.bf16.msra.mxu1 %v3852_v34  ;;  %v3099_v2 = vpop.eup %3098 }
 0x39b   : > { %2901 = vmatpush1.bf16.msra.mxu0 %v4780_v50  ;;  %v1147_v25 = vmul.f32 %v3970_v54, %v1146_v21  ;;  %v4783_v26 = vpack.c.bf16 %v3782_v38, %v3770_v32  ;;  %v1166_v18 = vand.u32 2147483647, %v3990_v16  ;;  %v993_v24 = vmax.f32 %v3906_v53, 0.0  ;;  %2935 = vmatprep.subr.bf16.mxu1 %v3888_v57 }
 0x39c   : > { %v1260_v17 = vsel %vm1004_vm12, %v3778_v35, %v1244_v13  ;;  %v1141_v12 = vsel %vm4090_vm15, %v1138_v15, %v1135_v1  ;;  %v1164_v54 = vadd.f32 1.0, %v1163_v55  ;;  %v1187_v20 = vadd.f32 1.0, %v4070_v27  ;;  %v3101_v32 = vpop.eup %3100 }
 0x39d   : > { %2903 = vmatprep.subr.bf16.mxu0 %v4783_v26  ;;  %v4144_v34 = vsel %vm3996_vm9, %v1260_v17, %v3778_v35  ;;  %v4784_v38 = vmax.f32 %v3832_v6, 0.0  ;;  %v1144_v44 = vmul.f32 0.6931472, %v3099_v2  ;;  %v1156_v19 = vmul.f32 %v4002_v52, %v1155_v14  ;;  %v4157_v49 = vpop.eup %3102  ;;  %v4789_v26 = vld [vmem:[#allocation21_spill] sm:$0xff] }
 0x39e   : > { %2654 = vmatmul.mubr.f32.gmra.mrb[34].mxu0 %v4144_v34  ;;  %1420 = vmatmul.mubr.f32.gmra.mrb[22].mxu1 %v4144_v34  ;;  %vm1008_vm5 = vcmp.ne.f32.partialorder %v3862_v30, %v3862_v30  ;;  %v1181_v35 = vmul.f32 -0.5, %v4034_v43  ;;  %v1153_v21 = vmul.f32 0.6931472, %v3101_v32  ;;  %v4785_v58 = vpack.c.bf16 %v3786_v40, %v3784_v39 }
 0x39f   : > { %v1245_v4 = vadd.f32 %v1141_v12, %v4784_v38  ;;  %1425 = vmatprep.mubr.f32.mxu1 %v4767_v56  ;;  %v1173_v42 = vadd.f32 1.0, %v1172_v60  ;;  %v1175_v15 = vand.u32 2147483647, %v4040_v9  ;;  %3110 = vlog2.f32 %v1187_v20  ;;  %2937 = vmatpush3.bf16.msra.mxu1 %v3888_v57  ;;  %v3105_v23 = vpop.eup %3104  ;;  %v4792_v20 = vld [vmem:[#allocation38_spill] sm:$0xff] }
 0x3a0   : > { %2905 = vmatpush1.bf16.msra.mxu0 %v4785_v58  ;;  %v1150_v55 = vsel %vm4112_vm2, %v1147_v25, %v1144_v44  ;;  %v4786_v22 = vpack.c.bf16 %v3797_v46, %v3795_v45  ;;  %v1190_v39 = vmul.f32 -0.5, %v4070_v27  ;;  %v1196_v40 = vadd.f32 1.0, %v4050_v41  ;;  %2939 = vmatprep.subr.bf16.mxu1 %v3898_v36  ;;  %v4793_v44 = vld [vmem:[#allocation23_spill] sm:$0xff] }
 0x3a1   : > { %v1261_v52 = vsel %vm1005_vm14, %v3832_v6, %v1245_v4  ;;  %v4787_v13 = vmax.f32 %v3816_v61, 0.0  ;;  %v1159_v14 = vsel %vm4124_vm4, %v1156_v19, %v1153_v21  ;;  %v1165_v45 = vmul.f32 %v3990_v16, %v1164_v54  ;;  %v4794_v19 = vld [vmem:[#allocation22_spill] sm:$0xff] }
 0x3a2   : > { %2907 = vmatprep.subr.bf16.mxu0 %v4786_v22  ;;  %v4179_v3 = vsel %vm3996_vm9, %v1261_v52, %v3832_v6  ;;  %vm1009_vm6 = vcmp.ne.f32.partialorder %v3906_v53, %v3906_v53  ;;  %v1247_v46 = vadd.f32 %v1159_v14, %v991_v62  ;;  %v1162_v6 = vmul.f32 0.6931472, %v3105_v23 }
 0x3a3   : > { %v1246_v8 = vadd.f32 %v1150_v55, %v4787_v13  ;;  %2656 = vmatprep.mubr.f32.mxu0 %v4179_v3  ;;  %1426 = vmatmul.mubr.f32.gmra.mrb[24].mxu1 %v4179_v3  ;;  %v1182_v57 = vadd.f32 1.0, %v1181_v35  ;;  %3112 = vlog2.f32 %v1196_v40  ;;  %vm1167_vm8 = vcmp.lt.f32.partialorder %v1166_v18, 0.0004427343  ;;  %v3107_v11 = vpop.eup %3106 }
 0x3a4   : > { %v1174_v1 = vmul.f32 %v4040_v9, %v1173_v42  ;;  %v1184_v50 = vand.u32 2147483647, %v4034_v43  ;;  %v4788_v62 = vpack.c.bf16 %v3801_v48, %v3799_v47  ;;  %1431 = vmatprep.mubr.f32.mxu1 %v4767_v56  ;;  %v1263_v17 = vsel %vm1007_vm3, %v3876_v29, %v1247_v46  ;;  %2941 = vmatpush3.bf16.msra.mxu1 %v3898_v36  ;;  %v3109_v47 = vpop.eup %3108  ;;  %v4796_v42 = vld [vmem:[#allocation26_spill] sm:$0xff] }
 0x3a5   : > { %v1262_v16 = vsel %vm1006_vm1, %v3816_v61, %v1246_v8  ;;  %v1168_v9 = vsel %vm1167_vm8, %v1165_v45, %v1162_v6  ;;  %v1191_v25 = vadd.f32 1.0, %v1190_v39  ;;  %v4790_v18 = vpack.c.bf16 %v3820_v0, %v4789_v26  ;;  %2943 = vmatprep.subr.bf16.mxu1 %v4792_v20  ;;  %v4800_v45 = vld [vmem:[#allocation42_spill] sm:$0xff]  ;;  %v4801_v6 = vld [vmem:[#allocation28_spill] sm:$0xff]  ;;  %v4807_v26 = vld [vmem:[#allocation41_spill] sm:$0xff] }
 0x3a6   : > { %2909 = vmatpush1.bf16.msra.mxu0 %v4788_v62  ;;  %v4208_v60 = vsel %vm3996_vm9, %v1262_v16, %v3816_v61  ;;  %v4222_v48 = vsel %vm3996_vm9, %v1263_v17, %v3876_v29  ;;  %v4791_v61 = vmax.f32 %v3862_v30, 0.0  ;;  %v1171_v12 = vmul.f32 0.6931472, %v3107_v11  ;;  %v4804_v11 = vld [vmem:[#allocation31_spill] sm:$0xff]  ;;  %v4805_v17 = vld [vmem:[#allocation30_spill] sm:$0xff] }
 0x3a7   : > { %2911 = vmatprep.subr.bf16.mxu0 %v4790_v18  ;;  %2657 = vmatmul.mubr.f32.gmra.mrb[36].mxu0 %v4208_v60  ;;  %v1199_v54 = vmul.f32 -0.5, %v4050_v41  ;;  %vm1176_vm10 = vcmp.lt.f32.partialorder %v1175_v15, 0.0004427343  ;;  %v1180_v0 = vmul.f32 0.6931472, %v3109_v47  ;;  %v1183_v36 = vmul.f32 %v4034_v43, %v1182_v57  ;;  %v4797_v15 = vld [vmem:[#allocation25_spill] sm:$0xff] }
 0x3a8   : > { %v1248_v2 = vadd.f32 %v1168_v9, %v4791_v61  ;;  %2659 = vmatprep.mubr.f32.mxu0 %v4222_v48  ;;  %1432 = vmatmul.mubr.f32.gmra.mrb[26].mxu1 %v4208_v60  ;;  %v1205_v32 = vadd.f32 1.0, %v4099_v28  ;;  %v1177_v38 = vsel %vm1176_vm10, %v1174_v1, %v1171_v12  ;;  %vm1185_vm11 = vcmp.lt.f32.partialorder %v1184_v50, 0.0004427343  ;;  %v4802_v57 = vld [vmem:[#allocation27_spill] sm:$0xff] }
 0x3a9   : > { %v1193_v4 = vand.u32 2147483647, %v4070_v27  ;;  %v4795_v35 = vpack.c.bf16 %v4793_v44, %v4794_v19  ;;  %1437 = vmatprep.mubr.f32.mxu1 %v4767_v56  ;;  %v1249_v21 = vadd.f32 %v1177_v38, %v993_v24  ;;  %v1186_v58 = vsel %vm1185_vm11, %v1183_v36, %v1180_v0  ;;  %2945 = vmatpush3.bf16.msra.mxu1 %v4792_v20  ;;  %v3111_v55 = vpop.eup %3110  ;;  %v4799_v24 = vld [vmem:[#allocation39_spill] sm:$0xff]  ;;  %v4808_v20 = vld [vmem:[#allocation40_spill] sm:$0xff] }
 0x3aa   : > { %v1264_v29 = vsel %vm1008_vm5, %v3862_v30, %v1248_v2  ;;  %3114 = vlog2.f32 %v1205_v32  ;;  %v4798_v52 = vpack.c.bf16 %v4796_v42, %v4797_v15  ;;  %v1250_v22 = vadd.f32 %v1186_v58, %v994_v33  ;;  %2947 = vmatprep.subr.bf16.mxu1 %v4799_v24  ;;  %v4809_v32 = vld [vmem:[#allocation33_spill] sm:$0xff]  ;;  %v4812_v19 = vld [vmem:[#allocation44_spill] sm:$0xff] }
 0x3ab   : > { %2913 = vmatpush1.bf16.msra.mxu0 %v4795_v35  ;;  %v4244_v43 = vsel %vm3996_vm9, %v1264_v29, %v3862_v30  ;;  %v1192_v30 = vmul.f32 %v4070_v27, %v1191_v25  ;;  %v1200_v39 = vadd.f32 1.0, %v1199_v54  ;;  %v1202_v40 = vand.u32 2147483647, %v4050_v41 }
 0x3ac   : > { %2915 = vmatprep.subr.bf16.mxu0 %v4798_v52  ;;  %2660 = vmatmul.mubr.f32.gmra.mrb[38].mxu0 %v4244_v43  ;;  %v1265_v23 = vsel %vm1009_vm6, %v3906_v53, %v1249_v21  ;;  %v1189_v13 = vmul.f32 0.6931472, %v3111_v55  ;;  %v1208_v8 = vmul.f32 -0.5, %v4099_v28  ;;  %v1214_v14 = vadd.f32 1.0, %v4083_v51 }
 0x3ad   : > { %1438 = vmatmul.mubr.f32.gmra.mrb[28].mxu1 %v4222_v48  ;;  %v4268_v33 = vsel %vm3996_vm9, %v1265_v23, %v3906_v53  ;;  %v1266_v27 = vsel %vm1010_vm7, %v3896_v7, %v1250_v22  ;;  %v995_v46 = vmax.f32 %v4800_v45, 0.0  ;;  %vm1194_vm12 = vcmp.lt.f32.partialorder %v1193_v4, 0.0004427343  ;;  %v3113_v1 = vpop.eup %3112 }
 0x3ae   : > { %v4803_v16 = vpack.c.bf16 %v4801_v6, %v4802_v57  ;;  %1443 = vmatprep.mubr.f32.mxu1 %v4767_v56  ;;  %2662 = vmatprep.mubr.f32.mxu0 %v4268_v33  ;;  %v4283_v50 = vsel %vm3996_vm9, %v1266_v27, %v3896_v7  ;;  %vm1011_vm13 = vcmp.ne.f32.partialorder %v4800_v45, %v4800_v45  ;;  %3116 = vlog2.f32 %v1214_v14  ;;  %v4817_v6 = vld [vmem:[#allocation46_spill] sm:$0xff] }
 0x3af   : > { %v1195_v62 = vsel %vm1194_vm12, %v1192_v30, %v1189_v13  ;;  %v4806_v9 = vpack.c.bf16 %v4804_v11, %v4805_v17  ;;  %v996_v18 = vmax.f32 %v4807_v26, 0.0  ;;  %v1198_v47 = vmul.f32 0.6931472, %v3113_v1  ;;  %2949 = vmatpush3.bf16.msra.mxu1 %v4799_v24  ;;  %v4814_v13 = vld [vmem:[#allocation43_spill] sm:$0xff] }
 0x3b0   : > { %2917 = vmatpush1.bf16.msra.mxu0 %v4803_v16  ;;  %v1251_v25 = vadd.f32 %v1195_v62, %v995_v46  ;;  %v1201_v61 = vmul.f32 %v4050_v41, %v1200_v39  ;;  %vm1203_vm14 = vcmp.lt.f32.partialorder %v1202_v40, 0.0004427343  ;;  %v1209_v2 = vadd.f32 1.0, %v1208_v8  ;;  %2951 = vmatprep.subr.bf16.mxu1 %v4808_v20  ;;  %v4810_v41 = vld [vmem:[#allocation32_spill] sm:$0xff]  ;;  %v4819_v62 = vld [vmem:[#allocation45_spill] sm:$0xff] }
 0x3b1   : > { %2919 = vmatprep.subr.bf16.mxu0 %v4806_v9  ;;  %2663 = vmatmul.mubr.f32.gmra.mrb[40].mxu0 %v4283_v50  ;;  %v1217_v12 = vmul.f32 -0.5, %v4083_v51  ;;  %v1223_v54 = vadd.f32 1.0, %v4157_v49  ;;  %v4811_v29 = vpack.c.bf16 %v4809_v32, %v4810_v41  ;;  %v1211_v44 = vand.u32 2147483647, %v4099_v28 }
 0x3b2   : > { %1444 = vmatmul.mubr.f32.gmra.mrb[30].mxu1 %v4244_v43  ;;  %v1267_v0 = vsel %vm1011_vm13, %v4800_v45, %v1251_v25  ;;  %v1204_v36 = vsel %vm1203_vm14, %v1201_v61, %v1198_v47  ;;  %vm1012_vm15 = vcmp.ne.f32.partialorder %v4807_v26, %v4807_v26  ;;  %v997_v35 = vmax.f32 %v4812_v19, 0.0 }
 0x3b3   : > { %1449 = vmatprep.mubr.f32.mxu1 %v4767_v56  ;;  %v4309_v38 = vsel %vm3996_vm9, %v1267_v0, %v4800_v45  ;;  %v1252_v4 = vadd.f32 %v1204_v36, %v996_v18  ;;  %3118 = vlog2.f32 %v1223_v54  ;;  %vm1013_vm1 = vcmp.ne.f32.partialorder %v4812_v19, %v4812_v19  ;;  %2953 = vmatpush3.bf16.msra.mxu1 %v4808_v20 }
 0x3b4   : > { %2921 = vmatpush1.bf16.msra.mxu0 %v4811_v29  ;;  %2665 = vmatprep.mubr.f32.mxu0 %v4309_v38  ;;  %v3115_v21 = vpop.eup %3114  ;;  %v1210_v42 = vmul.f32 %v4099_v28, %v1209_v2  ;;  %v1218_v15 = vadd.f32 1.0, %v1217_v12  ;;  %v1232_v52 = vadd.f32 1.0, %v4117_v37  ;;  %v1226_v30 = vmul.f32 -0.5, %v4157_v49 }
 0x3b5   : > { %v1268_v58 = vsel %vm1012_vm15, %v4807_v26, %v1252_v4  ;;  %v1207_v22 = vmul.f32 0.6931472, %v3115_v21  ;;  %v4333_v39 = vsel %vm2077_vm0, %v3896_v7, 0.0  ;;  %vm1212_vm2 = vcmp.lt.f32.partialorder %v1211_v44, 0.0004427343 }
 0x3b6   : > { %1450 = vmatmul.mubr.f32.gmra.mrb[32].mxu1 %v4268_v33  ;;  %v4326_v55 = vsel %vm3996_vm9, %v1268_v58, %v4807_v26  ;;  %v1220_v28 = vand.u32 2147483647, %v4083_v51  ;;  %3120 = vlog2.f32 %v1232_v52  ;;  %v4340_v40 = vsel %vm2077_vm0, %v3906_v53, 0.0 }
 0x3b7   : > { %1455 = vmatprep.mubr.f32.mxu1 %v4767_v56  ;;  %2666 = vmatmul.mubr.f32.gmra.mrb[42].mxu0 %v4326_v55  ;;  %v1213_v24 = vsel %vm1212_vm2, %v1210_v42, %v1207_v22  ;;  %v4345_v23 = vsel %vm2077_vm0, %v4807_v26, 0.0  ;;  %v4350_v7 = vsel %vm2077_vm0, %v4800_v45, 0.0  ;;  %v4355_v8 = vsel %vm2077_vm0, %v4814_v13, 0.0 }
 0x3b8   : > { %4813 = vst [vmem:[#allocation21_spill] sm:$0xff] %v4345_v23  ;;  %4815 = vst [vmem:[#allocation38_spill] sm:$0xff] %v4355_v8  ;;  %v3117_v14 = vpop.eup %3116  ;;  %v1253_v27 = vadd.f32 %v1213_v24, %v997_v35  ;;  %v1219_v53 = vmul.f32 %v4083_v51, %v1218_v15  ;;  %v4362_v46 = vsel %vm2077_vm0, %v4812_v19, 0.0  ;;  %v4367_v45 = vsel %vm2077_vm0, %v4817_v6, 0.0  ;;  %v4827_v23 = vld [vmem:[#allocation19_spill] sm:$0xff] }
 0x3b9   : > { %4816 = vst [vmem:[#allocation23_spill] sm:$0xff] %v4362_v46  ;;  %4818 = vst [vmem:[#allocation22_spill] sm:$0xff] %v4367_v45  ;;  %v1216_v57 = vmul.f32 0.6931472, %v3117_v14  ;;  %v1227_v16 = vadd.f32 1.0, %v1226_v30  ;;  %v1235_v1 = vmul.f32 -0.5, %v4117_v37  ;;  %vm1015_vm5 = vcmp.ne.f32.partialorder %v4817_v6, %v4817_v6 }
 0x3ba   : > { %1456 = vmatmul.mubr.f32.gmra.mrb[34].mxu1 %v4283_v50  ;;  %v4374_v51 = vsel %vm2077_vm0, %v4819_v62, 0.0  ;;  %v1269_v11 = vsel %vm1013_vm1, %v4812_v19, %v1253_v27  ;;  %v998_v17 = vmax.f32 %v4814_v13, 0.0  ;;  %vm1221_vm3 = vcmp.lt.f32.partialorder %v1220_v28, 0.0004427343 }
 0x3bb   : > { %1461 = vmatprep.mubr.f32.mxu1 %v4767_v56  ;;  %4820 = vst [vmem:[#allocation26_spill] sm:$0xff] %v4374_v51  ;;  %v1229_v9 = vand.u32 2147483647, %v4157_v49  ;;  %v4385_v25 = vsel %vm3996_vm9, %v1269_v11, %v4812_v19  ;;  %v1222_v26 = vsel %vm1221_vm3, %v1219_v53, %v1216_v57  ;;  %vm1014_vm0 = vcmp.ne.f32.partialorder %v4814_v13, %v4814_v13 }
 0x3bc   : > { %2668 = vmatprep.mubr.f32.mxu0 %v4385_v25  ;;  %v1254_v10 = vadd.f32 %v1222_v26, %v998_v17  ;;  %v1228_v61 = vmul.f32 %v4157_v49, %v1227_v16  ;;  %v1236_v2 = vadd.f32 1.0, %v1235_v1  ;;  %v999_v54 = vmax.f32 %v4817_v6, 0.0 }
 0x3bd   : > { %v3119_v18 = vpop.eup %3118  ;;  %vm1230_vm4 = vcmp.lt.f32.partialorder %v1229_v9, 0.0004427343  ;;  %v1238_v20 = vand.u32 2147483647, %v4117_v37  ;;  %v1000_v44 = vmax.f32 %v4819_v62, 0.0  ;;  %vm1016_vm7 = vcmp.ne.f32.partialorder %v4819_v62, %v4819_v62 }
 0x3be   : > { %1462 = vmatmul.mubr.f32.gmra.mrb[36].mxu1 %v4309_v38  ;;  %v1225_v47 = vmul.f32 0.6931472, %v3119_v18  ;;  %v1270_v12 = vsel %vm1014_vm0, %v4814_v13, %v1254_v10  ;;  %v1237_v29 = vmul.f32 %v4117_v37, %v1236_v2 }
 0x3bf   : > { %1467 = vmatprep.mubr.f32.mxu1 %v4767_v56  ;;  %v4399_v0 = vsel %vm3996_vm9, %v1270_v12, %v4814_v13  ;;  %vm1239_vm6 = vcmp.lt.f32.partialorder %v1238_v20, 0.0004427343 }
 0x3c0   : > { %v1231_v36 = vsel %vm1230_vm4, %v1228_v61, %v1225_v47  ;;  %v3121_v32 = vpop.eup %3120  ;;  %2669 = vmatmul.mubr.f32.gmra.mrb[44].mxu0 %v4399_v0 }
 0x3c1   : > { %v1255_v49 = vadd.f32 %v1231_v36, %v999_v54  ;;  %v1234_v41 = vmul.f32 0.6931472, %v3121_v32 }
 0x3c2   : > { %1468 = vmatmul.mubr.f32.gmra.mrb[38].mxu1 %v4326_v55 }
 0x3c3   : > { %1473 = vmatprep.mubr.f32.mxu1 %v4767_v56  ;;  %v1271_v4 = vsel %vm1015_vm5, %v4817_v6, %v1255_v49  ;;  %v1240_v35 = vsel %vm1239_vm6, %v1237_v29, %v1234_v41 }
 0x3c4   : > { %v1287_v19 = vsel %vm3996_vm9, %v1271_v4, %v4817_v6  ;;  %v1256_v21 = vadd.f32 %v1240_v35, %v1000_v44 }
 0x3c5   : > { %2671 = vmatprep.mubr.f32.mxu0 %v1287_v19 }
 0x3c6   : > { %1474 = vmatmul.mubr.f32.gmra.mrb[40].mxu1 %v4385_v25  ;;  %v1272_v37 = vsel %vm1016_vm7, %v4819_v62, %v1256_v21 }
 0x3c7   : > { %1479 = vmatprep.mubr.f32.mxu1 %v4767_v56  ;;  %v1288_v58 = vsel %vm3996_vm9, %v1272_v37, %v4819_v62 }
 0x3c8   : > { %2672 = vmatmul.mubr.f32.gmra.mrb[46].mxu0 %v1288_v58 }
 0x3c9   : > { %1755 = vmatprep.mubr.f32.mxu0 %v4767_v56 }
 0x3ca   : > { %1480 = vmatmul.mubr.f32.gmra.mrb[42].mxu1 %v4399_v0 }
 0x3cb   : > { %1485 = vmatprep.mubr.f32.mxu1 %v4767_v56 }
 0x3cc   : > { %1756 = vmatmul.mubr.f32.vlgmr.msra.gmra.mrb[48].mxu0 %v4019_v59 }
 0x3cd   : > { %1761 = vmatprep.mubr.f32.mxu0 %v4767_v56 }
 0x3ce   : > { %1486 = vmatmul.mubr.f32.gmra.mrb[44].mxu1 %v1287_v19 }
 0x3cf   : > { %1491 = vmatprep.mubr.f32.mxu1 %v4767_v56 }
 0x3d0   : > { %1762 = vmatmul.mubr.f32.gmra.mrb[50].mxu0 %v4030_v31 }
 0x3d1   : > { %1767 = vmatprep.mubr.f32.mxu0 %v4767_v56 }
 0x3d2   : > { %1492 = vmatmul.mubr.f32.gmra.mrb[46].mxu1 %v1288_v58 }
 0x3d3   : > { %2706 = vmatprep.mubr.f32.mxu1 %v4019_v59 }
 0x3d4   : > { %1768 = vmatmul.mubr.f32.gmra.mrb[52].mxu0 %v4088_v5 }
 0x3d5   : > { %1773 = vmatprep.mubr.f32.mxu0 %v4767_v56 }
 0x3d6   : > { %2707 = vmatmul.mubr.f32.vlgmr.msra.gmra.mrb[48].mxu1 %v4030_v31 }
 0x3d7   : > { %2709 = vmatprep.mubr.f32.mxu1 %v4088_v5 }
 0x3d8   : > { %1774 = vmatmul.mubr.f32.gmra.mrb[54].mxu0 %v4144_v34 }
 0x3d9   : > { %1779 = vmatprep.mubr.f32.mxu0 %v4767_v56 }
 0x3da   : > { %2710 = vmatmul.mubr.f32.gmra.mrb[50].mxu1 %v4144_v34 }
 0x3db   : > { %2712 = vmatprep.mubr.f32.mxu1 %v4179_v3 }
 0x3dc   : > { %1780 = vmatmul.mubr.f32.gmra.mrb[56].mxu0 %v4179_v3 }
 0x3dd   : > { %1785 = vmatprep.mubr.f32.mxu0 %v4767_v56 }
 0x3de   : > { %2713 = vmatmul.mubr.f32.gmra.mrb[52].mxu1 %v4208_v60 }
 0x3df   : > { %2715 = vmatprep.mubr.f32.mxu1 %v4222_v48 }
 0x3e0   : > { %1786 = vmatmul.mubr.f32.gmra.mrb[58].mxu0 %v4208_v60 }
 0x3e1   : > { %1791 = vmatprep.mubr.f32.mxu0 %v4767_v56 }
 0x3e2   : > { %2716 = vmatmul.mubr.f32.gmra.mrb[54].mxu1 %v4244_v43 }
 0x3e3   : > { %2718 = vmatprep.mubr.f32.mxu1 %v4268_v33 }
 0x3e4   : > { %1792 = vmatmul.mubr.f32.gmra.mrb[60].mxu0 %v4222_v48 }
 0x3e5   : > { %1797 = vmatprep.mubr.f32.mxu0 %v4767_v56 }
 0x3e6   : > { %2719 = vmatmul.mubr.f32.gmra.mrb[56].mxu1 %v4283_v50 }
 0x3e7   : > { %2721 = vmatprep.mubr.f32.mxu1 %v4309_v38 }
 0x3e8   : > { %1798 = vmatmul.mubr.f32.gmra.mrb[62].mxu0 %v4244_v43 }
 0x3e9   : > { %1803 = vmatprep.mubr.f32.mxu0 %v4767_v56 }
 0x3ea   : > { %2722 = vmatmul.mubr.f32.gmra.mrb[58].mxu1 %v4326_v55 }
 0x3eb   : > { %2724 = vmatprep.mubr.f32.mxu1 %v4385_v25 }
 0x3ec   : > { %1804 = vmatmul.mubr.f32.gmra.mrb[64].mxu0 %v4268_v33 }
 0x3ed   : > { %1809 = vmatprep.mubr.f32.mxu0 %v4767_v56 }
 0x3ee   : > { %2725 = vmatmul.mubr.f32.gmra.mrb[60].mxu1 %v4399_v0 }
 0x3ef   : > { %2727 = vmatprep.mubr.f32.mxu1 %v1287_v19 }
 0x3f0   : > { %1810 = vmatmul.mubr.f32.gmra.mrb[66].mxu0 %v4283_v50 }
 0x3f1   : > { %1815 = vmatprep.mubr.f32.mxu0 %v4767_v56 }
 0x3f2   : > { %2728 = vmatmul.mubr.f32.gmra.mrb[62].mxu1 %v1288_v58 }
 0x3f4   : > { %1816 = vmatmul.mubr.f32.gmra.mrb[68].mxu0 %v4309_v38 }
 0x3f5   : > { %1821 = vmatprep.mubr.f32.mxu0 %v4767_v56 }
 0x3f8   : > { %1822 = vmatmul.mubr.f32.gmra.mrb[70].mxu0 %v4326_v55 }
 0x3f9   : > { %1827 = vmatprep.mubr.f32.mxu0 %v4767_v56 }
 0x3fc   : > { %1828 = vmatmul.mubr.f32.gmra.mrb[72].mxu0 %v4385_v25 }
 0x3fd   : > { %1833 = vmatprep.mubr.f32.mxu0 %v4767_v56 }
 0x400   : > { %1834 = vmatmul.mubr.f32.gmra.mrb[74].mxu0 %v4399_v0 }
 0x401   : > { %1839 = vmatprep.mubr.f32.mxu0 %v4767_v56 }
 0x404   : > { %1840 = vmatmul.mubr.f32.gmra.mrb[76].mxu0 %v1287_v19 }
 0x405   : > { %1845 = vmatprep.mubr.f32.mxu0 %v4767_v56 }
 0x408   : > { %1846 = vmatmul.mubr.f32.gmra.mrb[78].mxu0 %v1288_v58 }
 0x462   : > { %v1403_v63 = vpop.f32.mrb[16].mxu1 }
 0x463   : > { %v1405_v59 = vpop.f32.mrb[17].mxu1  ;;  %v2652_v31 = vpop.f32.mrb[32].mxu0 }
 0x464   : > { %v1564_v5 = vpop.f32.mrb[33].mxu0 }
 0x466   : > { %v1409_v34 = vpop.f32.mrb[18].mxu1 }
 0x467   : > { %v1411_v3 = vpop.f32.mrb[19].mxu1 }
 0x46c   : > { %v1415_v60 = vpop.f32.mrb[20].mxu1 }
 0x46d   : > { %v1417_v48 = vpop.f32.mrb[21].mxu1 }
 0x471   : > { %v4467_v43 = vpop.f32.mrb[34].mxu0  ;;  %v1421_v33 = vpop.f32.mrb[22].mxu1 }
 0x472   : > { %v4469_v50 = vpop.f32.mrb[35].mxu0  ;;  %v4471_v38 = vpop.f32.mrb[23].mxu1 }
 0x476   : > { %v4473_v42 = vpop.f32.mrb[24].mxu1 }
 0x477   : > { %v4475_v15 = vpop.f32.mrb[25].mxu1 }
 0x47a   : > { %v4477_v56 = vpop.f32.mrb[36].mxu0 }
 0x47b   : > { %v4479_v52 = vpop.f32.mrb[37].mxu0  ;;  %v4481_v55 = vpop.f32.mrb[26].mxu1 }
 0x47c   : > { %v4483_v22 = vpop.f32.mrb[27].mxu1 }
 0x47f   : > { %v4485_v30 = vpop.f32.mrb[38].mxu0 }
 0x480   : > { %v4487_v28 = vpop.f32.mrb[39].mxu0  ;;  %v4489_v24 = vpop.f32.mrb[28].mxu1 }
 0x481   : > { %v4491_v13 = vpop.f32.mrb[29].mxu1 }
 0x484   : > { %v4493_v14 = vpop.f32.mrb[40].mxu0 }
 0x485   : > { %v4495_v27 = vpop.f32.mrb[41].mxu0  ;;  %v4497_v53 = vpop.f32.mrb[30].mxu1 }
 0x486   : > { %v4499_v6 = vpop.f32.mrb[31].mxu1 }
 0x489   : > { %v4501_v57 = vpop.f32.mrb[32].mxu1 }
 0x48a   : > { %v4503_v16 = vpop.f32.mrb[33].mxu1  ;;  %v4505_v1 = vpop.f32.mrb[42].mxu0 }
 0x48b   : > { %v4507_v62 = vpop.f32.mrb[43].mxu0 }
 0x48d   : > { %v4509_v11 = vpop.f32.mrb[34].mxu1 }
 0x48e   : > { %v4511_v17 = vpop.f32.mrb[35].mxu1 }
 0x491   : > { %v4513_v9 = vpop.f32.mrb[36].mxu1 }
 0x492   : > { %v4515_v25 = vpop.f32.mrb[37].mxu1 }
 0x493   : > { %v4517_v26 = vpop.f32.mrb[44].mxu0 }
 0x494   : > { %v4521_v10 = vpop.f32.mrb[45].mxu0 }
 0x495   : > { %v4519_v18 = vpop.f32.mrb[38].mxu1 }
 0x496   : > { %v4523_v47 = vpop.f32.mrb[39].mxu1 }
 0x499   : > { %v4525_v61 = vpop.f32.mrb[40].mxu1 }
 0x49a   : > { %v4527_v2 = vpop.f32.mrb[41].mxu1 }
 0x49b   : > { %v4529_v12 = vpop.f32.mrb[46].mxu0 }
 0x49c   : > { %v4533_v20 = vpop.f32.mrb[47].mxu0 }
 0x49d   : > { %v4531_v54 = vpop.f32.mrb[42].mxu1 }
 0x49e   : > { %4821 = vst [vmem:[#allocation25_spill] sm:$0xff] %v4531_v54  ;;  %v4535_v0 = vpop.f32.mrb[43].mxu1 }
 0x49f   : > { %4822 = vst [vmem:[#allocation39_spill] sm:$0xff] %v4535_v0  ;;  %v1757_v36 = vpop.f32.mrb[48].mxu0 }
 0x4a0   : > { %v1997_v49 = vmul.f32 %v1757_v36, %v1403_v63  ;;  %v1759_v41 = vpop.f32.mrb[49].mxu0 }
 0x4a1   : > { %v4537_v32 = vpop.f32.mrb[44].mxu1  ;;  %v1998_v4 = vmul.f32 %v1759_v41, %v1405_v59 }
 0x4a2   : > { %4823 = vst [vmem:[#allocation42_spill] sm:$0xff] %v4537_v32  ;;  %v4539_v29 = vpop.f32.mrb[45].mxu1 }
 0x4a3   : > { %4824 = vst [vmem:[#allocation28_spill] sm:$0xff] %v4539_v29  ;;  %v2045_v44 = vadd.f32 %v1998_v4, %v1997_v49  ;;  %v1763_v19 = vpop.f32.mrb[50].mxu0 }
 0x4a4   : > { %v2000_v21 = vmul.f32 %v1763_v19, %v1409_v34  ;;  %v1765_v37 = vpop.f32.mrb[51].mxu0 }
 0x4a5   : > { %v4541_v35 = vpop.f32.mrb[46].mxu1  ;;  %v2001_v51 = vmul.f32 %v1765_v37, %v1411_v3  ;;  %v4830_v37 = vld [vmem:[#allocation24_spill] sm:$0xff] }
 0x4a6   : > { %4825 = vst [vmem:[#allocation27_spill] sm:$0xff] %v4541_v35  ;;  %v4543_v58 = vpop.f32.mrb[47].mxu1 }
 0x4a7   : > { %4826 = vst [vmem:[#allocation31_spill] sm:$0xff] %v4543_v58  ;;  %v2046_v45 = vadd.f32 %v2001_v51, %v2000_v21  ;;  %v1769_v8 = vpop.f32.mrb[52].mxu0 }
 0x4a8   : > { %v2003_v0 = vmul.f32 %v1769_v8, %v1415_v60  ;;  %v1771_v54 = vpop.f32.mrb[53].mxu0  ;;  %v4828_v60 = vld [vmem:[#allocation20_spill] sm:$0xff] }
 0x4a9   : > { %v2708_v46 = vpop.f32.mrb[48].mxu1  ;;  %v2004_v36 = vmul.f32 %v1771_v54, %v1417_v48 }
 0x4aa   : > { %v2002_v32 = vmul.f32 %v2708_v46, %v2652_v31  ;;  %v1918_v63 = vpop.f32.mrb[49].mxu1 }
 0x4ab   : > { %v1999_v29 = vmul.f32 %v1918_v63, %v1564_v5  ;;  %v2047_v49 = vadd.f32 %v2004_v36, %v2003_v0  ;;  %v1775_v41 = vpop.f32.mrb[54].mxu0 }
 0x4ac   : > { %v2062_v59 = vadd.f32 %v2046_v45, %v2002_v32  ;;  %v2006_v34 = vmul.f32 %v1775_v41, %v1421_v33  ;;  %v1777_v19 = vpop.f32.mrb[55].mxu0  ;;  %v4829_v32 = vld [vmem:[#allocation29_spill] sm:$0xff] }
 0x4ad   : > { %v2061_v4 = vadd.f32 %v2045_v44, %v1999_v29  ;;  %v2711_v35 = vpop.f32.mrb[50].mxu1  ;;  %v2007_v8 = vmul.f32 %v1777_v19, %v4471_v38 }
 0x4ae   : > { %v2095_v58 = vadd.f32 %v4827_v23, %v2062_v59  ;;  %v2008_v51 = vmul.f32 %v2711_v35, %v4467_v43  ;;  %v1928_v3 = vpop.f32.mrb[51].mxu1 }
 0x4af   : > { %v2094_v46 = vadd.f32 %v4828_v60, %v2061_v4  ;;  %v2005_v31 = vmul.f32 %v1928_v3, %v4469_v50  ;;  %v2048_v45 = vadd.f32 %v2007_v8, %v2006_v34  ;;  %v1781_v5 = vpop.f32.mrb[56].mxu0  ;;  %v4831_v34 = vld [vmem:[#allocation35_spill] sm:$0xff] }
 0x4b0   : > { %2111 = vst [vmem:[%s4552_s21 + $0x8] sm:$0xff] %v2095_v58  ;;  %v2009_v43 = vmul.f32 %v1781_v5, %v4473_v42  ;;  %v1783_v33 = vpop.f32.mrb[57].mxu0 }
 0x4b1   : > { %2110 = vst [vmem:[%s4552_s21] sm:$0xff] %v2094_v46  ;;  %v2063_v23 = vadd.f32 %v2047_v49, %v2005_v31  ;;  %v2714_v48 = vpop.f32.mrb[52].mxu1  ;;  %v2010_v50 = vmul.f32 %v1783_v33, %v4475_v15  ;;  %v2064_v0 = vadd.f32 %v2048_v45, %v2008_v51  ;;  %v4832_v45 = vld [vmem:[#allocation34_spill] sm:$0xff] }
 0x4b2   : > { %v2014_v38 = vmul.f32 %v2714_v48, %v4477_v56  ;;  %v1938_v54 = vpop.f32.mrb[53].mxu1 }
 0x4b3   : > { %v2096_v29 = vadd.f32 %v4829_v32, %v2063_v23  ;;  %v2011_v44 = vmul.f32 %v1938_v54, %v4479_v52  ;;  %v2049_v35 = vadd.f32 %v2010_v50, %v2009_v43  ;;  %v1787_v21 = vpop.f32.mrb[58].mxu0  ;;  %v2097_v58 = vadd.f32 %v4830_v37, %v2064_v0  ;;  %v4833_v50 = vld [vmem:[#allocation37_spill] sm:$0xff] }
 0x4b4   : > { %v2012_v42 = vmul.f32 %v1787_v21, %v4481_v55  ;;  %v1789_v36 = vpop.f32.mrb[59].mxu0 }
 0x4b5   : > { %2112 = vst [vmem:[%s4552_s21 + $0x10] sm:$0xff] %v2096_v29  ;;  %v2717_v63 = vpop.f32.mrb[54].mxu1  ;;  %v2013_v15 = vmul.f32 %v1789_v36, %v4483_v22  ;;  %2113 = vst [vmem:[%s4552_s21 + $0x18] sm:$0xff] %v2097_v58  ;;  %v2065_v49 = vadd.f32 %v2049_v35, %v2011_v44  ;;  %v4834_v58 = vld [vmem:[#allocation36_spill] sm:$0xff] }
 0x4b6   : > { %v2020_v56 = vmul.f32 %v2717_v63, %v4485_v30  ;;  %v1948_v59 = vpop.f32.mrb[55].mxu1 }
 0x4b7   : > { %v2017_v41 = vmul.f32 %v1948_v59, %v4487_v28  ;;  %v2050_v52 = vadd.f32 %v2013_v15, %v2012_v42  ;;  %v1793_v4 = vpop.f32.mrb[60].mxu0  ;;  %v2098_v19 = vadd.f32 %v4831_v34, %v2065_v49 }
 0x4b8   : > { %v2015_v3 = vmul.f32 %v1793_v4, %v4489_v24  ;;  %v1795_v8 = vpop.f32.mrb[61].mxu0 }
 0x4b9   : > { %v2720_v51 = vpop.f32.mrb[56].mxu1  ;;  %v2016_v60 = vmul.f32 %v1795_v8, %v4491_v13  ;;  %v2066_v46 = vadd.f32 %v2050_v52, %v2014_v38  ;;  %2114 = vst [vmem:[%s4552_s21 + $0x20] sm:$0xff] %v2098_v19 }
 0x4ba   : > { %v2026_v55 = vmul.f32 %v2720_v51, %v4493_v14  ;;  %v1958_v30 = vpop.f32.mrb[57].mxu1 }
 0x4bb   : > { %v2023_v22 = vmul.f32 %v1958_v30, %v4495_v27  ;;  %v2051_v31 = vadd.f32 %v2016_v60, %v2015_v3  ;;  %v1799_v28 = vpop.f32.mrb[62].mxu0  ;;  %v2099_v5 = vadd.f32 %v4832_v45, %v2066_v46 }
 0x4bc   : > { %v2018_v48 = vmul.f32 %v1799_v28, %v4497_v53  ;;  %v1801_v43 = vpop.f32.mrb[63].mxu0 }
 0x4bd   : > { %v2723_v23 = vpop.f32.mrb[58].mxu1  ;;  %v2019_v14 = vmul.f32 %v1801_v43, %v4499_v6  ;;  %2115 = vst [vmem:[%s4552_s21 + $0x28] sm:$0xff] %v2099_v5  ;;  %v2067_v13 = vadd.f32 %v2051_v31, %v2017_v41  ;;  %v4837_v5 = vld [vmem:[#allocation39_spill] sm:$0xff] }
 0x4be   : > { %v2032_v24 = vmul.f32 %v2723_v23, %v4505_v1  ;;  %v1968_v33 = vpop.f32.mrb[59].mxu1  ;;  %v4838_v43 = vld [vmem:[#allocation23_spill] sm:$0xff] }
 0x4bf   : > { %v2029_v38 = vmul.f32 %v1968_v33, %v4507_v62  ;;  %v2052_v54 = vadd.f32 %v2019_v14, %v2018_v48  ;;  %v1805_v27 = vpop.f32.mrb[64].mxu0  ;;  %v2100_v0 = vadd.f32 %v4833_v50, %v2067_v13 }
 0x4c0   : > { %v2021_v29 = vmul.f32 %v1805_v27, %v4501_v57  ;;  %v1807_v44 = vpop.f32.mrb[65].mxu0  ;;  %v4841_v27 = vld [vmem:[#allocation38_spill] sm:$0xff] }
 0x4c1   : > { %v2726_v32 = vpop.f32.mrb[60].mxu1  ;;  %v2022_v35 = vmul.f32 %v1807_v44, %v4503_v16  ;;  %v2068_v21 = vadd.f32 %v2052_v54, %v2020_v56  ;;  %2116 = vst [vmem:[%s4552_s21 + $0x30] sm:$0xff] %v2100_v0 }
 0x4c2   : > { %v2038_v53 = vmul.f32 %v2726_v32, %v4517_v26  ;;  %v1978_v1 = vpop.f32.mrb[61].mxu1 }
 0x4c3   : > { %v2035_v6 = vmul.f32 %v1978_v1, %v4521_v10  ;;  %v2053_v37 = vadd.f32 %v2022_v35, %v2021_v29  ;;  %v1811_v62 = vpop.f32.mrb[66].mxu0  ;;  %v2101_v63 = vadd.f32 %v4834_v58, %v2068_v21  ;;  %v4842_v29 = vld [vmem:[#allocation27_spill] sm:$0xff] }
 0x4c4   : > { %v2024_v36 = vmul.f32 %v1811_v62, %v4509_v11  ;;  %v1813_v57 = vpop.f32.mrb[67].mxu0  ;;  %v4843_v21 = vld [vmem:[#allocation31_spill] sm:$0xff] }
 0x4c5   : > { %v2729_v42 = vpop.f32.mrb[62].mxu1  ;;  %v2025_v26 = vmul.f32 %v1813_v57, %v4511_v17  ;;  %2117 = vst [vmem:[%s4552_s21 + $0x38] sm:$0xff] %v2101_v63  ;;  %v2069_v16 = vadd.f32 %v2053_v37, %v2023_v22  ;;  %v4844_v37 = vld [vmem:[#allocation22_spill] sm:$0xff] }
 0x4c6   : > { %v2044_v59 = vmul.f32 %v2729_v42, %v4529_v12  ;;  %v1988_v15 = vpop.f32.mrb[63].mxu1  ;;  %v4846_v63 = vld [vmem:[#allocation26_spill] sm:$0xff] }
 0x4c7   : > { %v2041_v56 = vmul.f32 %v1988_v15, %v4533_v20  ;;  %v2054_v10 = vadd.f32 %v2025_v26, %v2024_v36  ;;  %v1817_v49 = vpop.f32.mrb[68].mxu0  ;;  %v2102_v41 = vadd.f32 %v4340_v40, %v2069_v16 }
 0x4c8   : > { %v2027_v52 = vmul.f32 %v1817_v49, %v4513_v9  ;;  %v1819_v4 = vpop.f32.mrb[69].mxu0 }
 0x4c9   : > { %v2028_v11 = vmul.f32 %v1819_v4, %v4515_v25  ;;  %v2070_v34 = vadd.f32 %v2054_v10, %v2026_v55  ;;  %2118 = vst [vmem:[%s4552_s21 + $0x40] sm:$0xff] %v2102_v41 }
 0x4cb   : > { %v2055_v12 = vadd.f32 %v2028_v11, %v2027_v52  ;;  %v1823_v19 = vpop.f32.mrb[70].mxu0  ;;  %v2103_v17 = vadd.f32 %v4333_v39, %v2070_v34 }
 0x4cc   : > { %v2030_v51 = vmul.f32 %v1823_v19, %v4519_v18  ;;  %v1825_v3 = vpop.f32.mrb[71].mxu0  ;;  %v4835_v18 = vld [vmem:[#allocation21_spill] sm:$0xff] }
 0x4cd   : > { %v2031_v20 = vmul.f32 %v1825_v3, %v4523_v47  ;;  %2119 = vst [vmem:[%s4552_s21 + $0x48] sm:$0xff] %v2103_v17  ;;  %v2071_v40 = vadd.f32 %v2055_v12, %v2029_v38  ;;  %v4836_v47 = vld [vmem:[#allocation25_spill] sm:$0xff]  ;;  %v4840_v38 = vld [vmem:[#allocation28_spill] sm:$0xff] }
 0x4cf   : > { %v2056_v8 = vadd.f32 %v2031_v20, %v2030_v51  ;;  %v1829_v9 = vpop.f32.mrb[72].mxu0  ;;  %v2104_v30 = vadd.f32 %v4350_v7, %v2071_v40 }
 0x4d0   : > { %v2033_v25 = vmul.f32 %v1829_v9, %v4525_v61  ;;  %v1831_v55 = vpop.f32.mrb[73].mxu0 }
 0x4d1   : > { %v2034_v60 = vmul.f32 %v1831_v55, %v4527_v2  ;;  %v2072_v46 = vadd.f32 %v2056_v8, %v2032_v24  ;;  %2120 = vst [vmem:[%s4552_s21 + $0x50] sm:$0xff] %v2104_v30  ;;  %v4839_v2 = vld [vmem:[#allocation42_spill] sm:$0xff] }
 0x4d3   : > { %v2057_v39 = vadd.f32 %v2034_v60, %v2033_v25  ;;  %v2105_v22 = vadd.f32 %v4835_v18, %v2072_v46  ;;  %v1835_v31 = vpop.f32.mrb[74].mxu0 }
 0x4d4   : > { %v2036_v28 = vmul.f32 %v1835_v31, %v4836_v47  ;;  %v1837_v45 = vpop.f32.mrb[75].mxu0 }
 0x4d5   : > { %2121 = vst [vmem:[%s4552_s21 + $0x58] sm:$0xff] %v2105_v22  ;;  %v2037_v23 = vmul.f32 %v1837_v45, %v4837_v5  ;;  %v2073_v7 = vadd.f32 %v2057_v39, %v2035_v6 }
 0x4d7   : > { %v2058_v48 = vadd.f32 %v2037_v23, %v2036_v28  ;;  %v1841_v61 = vpop.f32.mrb[76].mxu0  ;;  %v2106_v33 = vadd.f32 %v4838_v43, %v2073_v7 }
 0x4d8   : > { %v2039_v24 = vmul.f32 %v1841_v61, %v4839_v2  ;;  %v1843_v14 = vpop.f32.mrb[77].mxu0 }
 0x4d9   : > { %v2074_v13 = vadd.f32 %v2058_v48, %v2038_v53  ;;  %2122 = vst [vmem:[%s4552_s21 + $0x60] sm:$0xff] %v2106_v33  ;;  %v2040_v54 = vmul.f32 %v1843_v14, %v4840_v38 }
 0x4db   : > { %v2107_v50 = vadd.f32 %v4841_v27, %v2074_v13  ;;  %v2059_v0 = vadd.f32 %v2040_v54, %v2039_v24  ;;  %v1847_v32 = vpop.f32.mrb[78].mxu0 }
 0x4dc   : > { %v2042_v44 = vmul.f32 %v1847_v32, %v4842_v29  ;;  %v1849_v1 = vpop.f32.mrb[79].mxu0 }
 0x4dd   : > { %2123 = vst [vmem:[%s4552_s21 + $0x68] sm:$0xff] %v2107_v50  ;;  %v2075_v35 = vadd.f32 %v2059_v0, %v2041_v56  ;;  %v2043_v6 = vmul.f32 %v1849_v1, %v4843_v21 }
 0x4df   : > { %v2108_v62 = vadd.f32 %v4844_v37, %v2075_v35  ;;  %v2060_v53 = vadd.f32 %v2043_v6, %v2042_v44 }
 0x4e1   : > { %2124 = vst [vmem:[%s4552_s21 + $0x70] sm:$0xff] %v2108_v62  ;;  %v2076_v58 = vadd.f32 %v2060_v53, %v2044_v59 }
 0x4e3   : > { %v2109_v42 = vadd.f32 %v4846_v63, %v2076_v58 }
 0x4e5   : > { %2125 = vst [vmem:[%s4552_s21 + $0x78] sm:$0xff] %v2109_v42 }
 0x4e6   : > { %3305 = shalt.err (!%p3302_p8)
}
 0x4e7   : > { %s3306_s13 = scalar_lea.hbm %s4623_s16, 2048  ;;  %s3310_s9 = scalar_lea.hbm %s4845_s27, 4096 }
 0x4e8   : > { %p3307_p6 = scmp.ne.s32.totalorder %s4623_s16, %s3306_s13  ;;  %p3311_p3 = scmp.lt.u32.totalorder %s4623_s16, %s4845_s27 }
 0x4e9   : > { %p3312_p5 = scmp.lt.u32.totalorder %s3310_s9, %s3306_s13  ;;  %p3314_p7 = scmp.lt.u32.totalorder %s3306_s13, %s4623_s16 }
 0x4ea   : > { %p3308_p10 = pnand %p3307_p6, %p4847_p4 }
 0x4eb   : > { %p3313_p9 = por %p3312_p5, %p3311_p3 }
 0x4ec   : > { %p3309_p11 = pneg %p3308_p10 }
 0x4ed   : > { %p3315_p12 = por %p3314_p7, %p3313_p9 }
 0x4ef   : > { %p3316_p1 = pnand %p3315_p12, %p3309_p11 }
 0x4f1   : > { %3319 = shalt.err (!%p3316_p1)
}
 0x4f2   : > { %s3384_s23 = smov 128   ;;  %s3385_s24 = smov 8  }
 0x4f3   : > { %2976 = dma.vmem_to_hbm [thread:$0]  (%p4847_p4), %s4625_s18, 2048, %s4623_s16, %s2127_s28, %s3384_s23, %s3384_s23, %s3385_s24  }
 0x4f4 PF: > { %s2155_s17 = sand.u32 1, %s3358_s30   ;;  %p4848_p13 = scmp.ne.s32.totalorder %s4722_s26, 0 }
 0x4f5   : > { %p4849_p0 = scmp.ge.s32.totalorder %s3370_s12, 2  ;;  %s2156_s13 = scalar_lea.sflag [#allocation4], %s2155_s17 }
 0x4f7   : > { %p2999_p2 = pnand %p4849_p0, %p4848_p13 }
 0x4f9   : > { %3353 = dma.done.wait (!%p2999_p2), %s2156_s13, 2048  }
 0x4fa   : > { %3355 = vsyncadd (!%p2999_p2), %s2156_s13, 4294965248  ;;  %p25_p8 = scmp.ge.s32.totalorder %s3603_s19, 4   ;;  %s4850_s30 = smov %s3362_s10 }
 0x4fb   : > { %s4851_s10 = smov %s3366_s11  ;;  %s4852_s11 = smov %s3615_s25 }
 0x4fc   : > { %s4853_s12 = smov %s3603_s19  ;;  %27 = sbr.rel (!%p25_p8) target bundleno = 10 (0xa), region = 121 }
 0x503   :  { %2161 = vsyncpa [#allocation3], 1 }
 0x504   :  { %2163 = vsyncpa [#allocation3 + $0x1], 1 }
 0x505   :  { %2164 = vsyncpa [#allocation6], 1 }
 0x506   :  { %2165 = vsyncpa [#allocation9], 1 }
 0x507   :  { %2166 = vsyncpa [#allocation12], 1 }
 0x508   :  { %2167 = vsyncpa [#allocation4], 1 }
 0x509   :  { %2169 = vsyncpa [#allocation4 + $0x1], 1 }

</bundles_post_ra>
